<compile_context>
chip_gen: v7x
topology: tpu7x:2x2x1
jax: 0.10.0
libtpu: 0.0.40
codegen_flags: <defaults>
</compile_context>

<pallas_src>
import math
from functools import partial

import jax
import jax.numpy as jnp
from jax.experimental import pallas as pl
from jax.experimental.pallas import tpu as pltpu


HP = 128   # padded hidden size: one full 128-lane tile per gate
OP = 128   # padded output size: lane-dense final store


# ---------------------------------------------------------------------------
# Pallas kernel: single (grid-less) invocation; the full time recurrence is an
# unrolled in-kernel loop.
#
#   gi_ref:   (S, B, 3*HP) f32  per-timestep input projections, gate-blocked
#                               [r | z | n], with b_ir+b_hr / b_iz+b_hz / b_in
#                               already folded in.
#   w_hh_ref: (HP, 3*HP)  bf16  recurrent weights, gate-blocked, zero-padded.
#   b_hn_ref: (1, HP)     f32   recurrent bias of the n-gate only.
#   w_fc_ref: (HP, OP)    bf16  final linear weights, zero-padded.
#   b_fc_ref: (1, OP)     f32
#   out_ref:  (B, OP)     f32
# ---------------------------------------------------------------------------
def gru_kernel(gi_ref, w_hh_ref, b_hn_ref, w_fc_ref, b_fc_ref, out_ref):
    S, B, _ = gi_ref.shape
    Hp = HP

    # Hoisted once (outside the serial loop): broadcast of the n-gate bias.
    b_hn = jnp.broadcast_to(b_hn_ref[...], (B, Hp))

    h0 = jnp.zeros((B, Hp), jnp.float32)

    def step(t, h):
        g = gi_ref[t]                                         # (B, 3*HP) f32
        gh = jnp.dot(h.astype(jnp.bfloat16), w_hh_ref[...],
                     preferred_element_type=jnp.float32)      # (B, 3*HP) f32
        r = jax.nn.sigmoid(g[:, 0:Hp] + gh[:, 0:Hp])
        z = jax.nn.sigmoid(g[:, Hp:2 * Hp] + gh[:, Hp:2 * Hp])
        # PyTorch GRU: n = tanh(W_in x + b_in + r * (W_hn h + b_hn))
        n = jnp.tanh(g[:, 2 * Hp:3 * Hp] + r * (gh[:, 2 * Hp:3 * Hp] + b_hn))
        return n + z * (h - n)                                # == (1-z)*n + z*h

    h_last = jax.lax.fori_loop(0, S, step, h0, unroll=True)

    out_ref[...] = (jnp.dot(h_last.astype(jnp.bfloat16), w_fc_ref[...],
                            preferred_element_type=jnp.float32)
                    + b_fc_ref[...])


def _gru_pallas(gi_p, w_hh_p, b_hn_p, w_fc_p, b_fc_p):
    S, B, _ = gi_p.shape
    vmem = pl.BlockSpec(memory_space=pltpu.MemorySpace.VMEM)
    return pl.pallas_call(
        gru_kernel,
        out_shape=jax.ShapeDtypeStruct((B, OP), jnp.float32),
        in_specs=[vmem, vmem, vmem, vmem, vmem],
        out_specs=vmem,
    )(gi_p, w_hh_p, b_hn_p, w_fc_p, b_fc_p)


# ---------------------------------------------------------------------------
# One-time parameter preprocessing (hoisted out of the per-call forward).
# ---------------------------------------------------------------------------
def prepare_params(params):
    emb, w_ih, b_ih = params["embedding"], params["w_ih"], params["b_ih"]
    w_hh, b_hh = params["w_hh"], params["b_hh"]
    w_fc, b_fc = params["w_fc"], params["b_fc"]

    H = w_hh.shape[0]
    O = w_fc.shape[1]
    V = emb.shape[0]

    # Fold embedding into the input projection ((emb @ W)[idx] == emb[idx] @ W)
    # and fold the r/z recurrent biases (bit-identical: they sit outside the
    # r-multiply).  The n-gate recurrent bias cannot be folded.
    proj = emb @ w_ih + b_ih                                   # (V, 3H) [r|z|n]
    proj = proj.at[:, 0:2 * H].add(b_hh[0, 0:2 * H])

    # Gate-block + zero-pad to (V, 3*HP) BEFORE the gather so jnp.take yields
    # the kernel input layout directly.  Same gate-blocking for W_hh.
    proj_p = jnp.zeros((V, 3 * HP), jnp.float32)
    w_hh_p = jnp.zeros((HP, 3 * HP), jnp.float32)
    for g in range(3):
        proj_p = proj_p.at[:, g * HP:g * HP + H].set(proj[:, g * H:(g + 1) * H])
        w_hh_p = w_hh_p.at[:H, g * HP:g * HP + H].set(w_hh[:, g * H:(g + 1) * H])

    b_hn_p = jnp.zeros((1, HP), jnp.float32).at[:, :H].set(b_hh[:, 2 * H:3 * H])
    # FC weights zero-padded so the padded lanes of h contribute nothing.
    w_fc_p = jnp.zeros((HP, OP), jnp.float32).at[:H, :O].set(w_fc)
    b_fc_p = jnp.zeros((1, OP), jnp.float32).at[:, :O].set(b_fc)

    return {
        "proj_table_p": proj_p,
        "w_hh_p": w_hh_p.astype(jnp.bfloat16),   # MXU operand, f32 accumulate
        "b_hn_p": b_hn_p,
        "w_fc_p": w_fc_p.astype(jnp.bfloat16),   # MXU operand, f32 accumulate
        "b_fc_p": b_fc_p,
    }


@partial(jax.jit, static_argnames=("output_dim",))
def naive_gru_forward(text, prepped, *, output_dim):
    """text: (seq_len, batch) int32 -> (batch, output_dim) float32."""
    gi_p = jnp.take(prepped["proj_table_p"], text, axis=0)     # (S, B, 3*HP)
    out_p = _gru_pallas(gi_p, prepped["w_hh_p"], prepped["b_hn_p"],
                        prepped["w_fc_p"], prepped["b_fc_p"])
    return out_p[:, :output_dim]


# ---------------------------------------------------------------------------
# Pure-JAX reference (mirrors torch semantics) for a correctness check.
# ---------------------------------------------------------------------------
def reference_forward(text, params):
    embedded = jnp.take(params["embedding"], text, axis=0)     # (S, B, E)
    H = params["w_hh"].shape[0]
    B = text.shape[1]

    def step(h, x):
        gi = x @ params["w_ih"] + params["b_ih"][0]
        gh = h @ params["w_hh"] + params["b_hh"][0]
        r = jax.nn.sigmoid(gi[:, 0:H] + gh[:, 0:H])
        z = jax.nn.sigmoid(gi[:, H:2 * H] + gh[:, H:2 * H])
        n = jnp.tanh(gi[:, 2 * H:3 * H] + r * gh[:, 2 * H:3 * H])
        h_new = (1.0 - z) * n + z * h
        return h_new, h_new

    h0 = jnp.zeros((B, H), jnp.float32)
    h_last, _ = jax.lax.scan(step, h0, embedded)
    return h_last @ params["w_fc"] + params["b_fc"][0]


def init_params(key, input_dim, embedding_dim, hidden_dim, output_dim):
    ks = jax.random.split(key, 8)
    k_gru = 1.0 / math.sqrt(hidden_dim)
    k_fc = 1.0 / math.sqrt(hidden_dim)
    return {
        # nn.Embedding default: N(0, 1)
        "embedding": jax.random.normal(ks[0], (input_dim, embedding_dim), jnp.float32),
        # GRU weights stored pre-transposed: (in, 3H) / (H, 3H), gate order [r,z,n]
        "w_ih": jax.random.uniform(ks[1], (embedding_dim, 3 * hidden_dim),
                                   jnp.float32, -k_gru, k_gru),
        "w_hh": jax.random.uniform(ks[2], (hidden_dim, 3 * hidden_dim),
                                   jnp.float32, -k_gru, k_gru),
        "b_ih": jax.random.uniform(ks[3], (1, 3 * hidden_dim),
                                   jnp.float32, -k_gru, k_gru),
        "b_hh": jax.random.uniform(ks[4], (1, 3 * hidden_dim),
                                   jnp.float32, -k_gru, k_gru),
        # nn.Linear stored pre-transposed: (H, O)
        "w_fc": jax.random.uniform(ks[5], (hidden_dim, output_dim),
                                   jnp.float32, -k_fc, k_fc),
        "b_fc": jax.random.uniform(ks[6], (1, output_dim),
                                   jnp.float32, -k_fc, k_fc),
    }


if __name__ == "__main__":
    INPUT_DIM = 50       # vocab size
    EMBEDDING_DIM = 32
    HIDDEN_DIM = 32
    OUTPUT_DIM = 16
    SEQ_LEN = 8
    BATCH = 8

    key = jax.random.PRNGKey(0)
    k_param, k_text = jax.random.split(key)
    params = init_params(k_param, INPUT_DIM, EMBEDDING_DIM, HIDDEN_DIM, OUTPUT_DIM)
    text = jax.random.randint(k_text, (SEQ_LEN, BATCH), 0, INPUT_DIM, jnp.int32)

    # One-time parameter preprocessing (not paid per inference call).
    prepped = prepare_params(params)

    out = jax.block_until_ready(
        naive_gru_forward(text, prepped, output_dim=OUTPUT_DIM))
    ref = jax.block_until_ready(reference_forward(text, params))

    assert out.shape == (BATCH, OUTPUT_DIM)
    # bf16 MXU operands (f32 accumulation) vs an all-f32 reference.
    assert jnp.allclose(out, ref, atol=2e-2, rtol=2e-2), "mismatch vs reference"
    print("KERNEL_OK")
</pallas_src>

<mosaic_0001>
module attributes {stable_mosaic.version = 11 : i64} {
  func.func @gru_kernel(%arg0: memref<8x8x384xf32, #tpu.memory_space<vmem>>, %arg1: memref<128x384xbf16, #tpu.memory_space<vmem>>, %arg2: memref<1x128xf32, #tpu.memory_space<vmem>>, %arg3: memref<128x128xbf16, #tpu.memory_space<vmem>>, %arg4: memref<1x128xf32, #tpu.memory_space<vmem>>, %arg5: memref<8x128xf32, #tpu.memory_space<vmem>>) attributes {dimension_semantics = [], scalar_prefetch = 0 : i64, scratch_operands = 0 : i64, tpu.core_type = #tpu.core_type<tc>} {
    %c0 = arith.constant 0 : index
    %c0_0 = arith.constant 0 : index
    %0 = vector.load %arg2[%c0, %c0_0] : memref<1x128xf32, #tpu.memory_space<vmem>>, vector<1x128xf32>
    %1 = vector.shape_cast %0 : vector<1x128xf32> to vector<1x128xf32>
    %2 = vector.broadcast %1 : vector<1x128xf32> to vector<8x128xf32>
    %cst = arith.constant 0.000000e+00 : f32
    %3 = vector.broadcast %cst : f32 to vector<8x128xf32>
    %c0_i32 = arith.constant 0 : i32
    %4 = arith.index_cast %c0_i32 : i32 to index
    %c0_1 = arith.constant 0 : index
    %c0_2 = arith.constant 0 : index
    %5 = vector.load %arg0[%4, %c0_1, %c0_2] : memref<8x8x384xf32, #tpu.memory_space<vmem>>, vector<1x8x384xf32>
    %6 = vector.shape_cast %5 : vector<1x8x384xf32> to vector<8x384xf32>
    %7 = arith.truncf %3 : vector<8x128xf32> to vector<8x128xbf16>
    %c0_3 = arith.constant 0 : index
    %c0_4 = arith.constant 0 : index
    %8 = vector.load %arg1[%c0_3, %c0_4] : memref<128x384xbf16, #tpu.memory_space<vmem>>, vector<128x384xbf16>
    %cst_5 = arith.constant dense<0.000000e+00> : vector<8x384xf32>
    %9 = tpu.matmul %7, %8, %cst_5 {dimension_numbers = #tpu.dot_dimension_numbers<[1], [0], [0], [1], [0, 0, 1, 1], [], []>} : vector<8x128xbf16>, vector<128x384xbf16>, vector<8x384xf32> -> vector<8x384xf32>
    %10 = vector.extract_strided_slice %6 {offsets = [0, 0], sizes = [8, 128], strides = [1, 1]} : vector<8x384xf32> to vector<8x128xf32>
    %11 = vector.extract_strided_slice %9 {offsets = [0, 0], sizes = [8, 128], strides = [1, 1]} : vector<8x384xf32> to vector<8x128xf32>
    %12 = arith.addf %10, %11 : vector<8x128xf32>
    %13 = arith.negf %12 : vector<8x128xf32>
    %14 = math.exp %13 : vector<8x128xf32>
    %cst_6 = arith.constant 1.000000e+00 : f32
    %15 = vector.broadcast %cst_6 : f32 to vector<8x128xf32>
    %16 = arith.addf %15, %14 : vector<8x128xf32>
    %17 = arith.divf %15, %16 : vector<8x128xf32>
    %18 = vector.extract_strided_slice %6 {offsets = [0, 128], sizes = [8, 128], strides = [1, 1]} : vector<8x384xf32> to vector<8x128xf32>
    %19 = vector.extract_strided_slice %9 {offsets = [0, 128], sizes = [8, 128], strides = [1, 1]} : vector<8x384xf32> to vector<8x128xf32>
    %20 = arith.addf %18, %19 : vector<8x128xf32>
    %21 = arith.negf %20 : vector<8x128xf32>
    %22 = math.exp %21 : vector<8x128xf32>
    %cst_7 = arith.constant 1.000000e+00 : f32
    %23 = vector.broadcast %cst_7 : f32 to vector<8x128xf32>
    %24 = arith.addf %23, %22 : vector<8x128xf32>
    %25 = arith.divf %23, %24 : vector<8x128xf32>
    %26 = vector.extract_strided_slice %6 {offsets = [0, 256], sizes = [8, 128], strides = [1, 1]} : vector<8x384xf32> to vector<8x128xf32>
    %27 = vector.extract_strided_slice %9 {offsets = [0, 256], sizes = [8, 128], strides = [1, 1]} : vector<8x384xf32> to vector<8x128xf32>
    %28 = arith.addf %27, %2 : vector<8x128xf32>
    %29 = arith.mulf %17, %28 : vector<8x128xf32>
    %30 = arith.addf %26, %29 : vector<8x128xf32>
    %31 = math.tanh %30 : vector<8x128xf32>
    %32 = arith.subf %3, %31 : vector<8x128xf32>
    %33 = arith.mulf %25, %32 : vector<8x128xf32>
    %34 = arith.addf %31, %33 : vector<8x128xf32>
    %c1_i32 = arith.constant 1 : i32
    %35 = arith.index_cast %c1_i32 : i32 to index
    %c0_8 = arith.constant 0 : index
    %c0_9 = arith.constant 0 : index
    %36 = vector.load %arg0[%35, %c0_8, %c0_9] : memref<8x8x384xf32, #tpu.memory_space<vmem>>, vector<1x8x384xf32>
    %37 = vector.shape_cast %36 : vector<1x8x384xf32> to vector<8x384xf32>
    %38 = arith.truncf %34 : vector<8x128xf32> to vector<8x128xbf16>
    %c0_10 = arith.constant 0 : index
    %c0_11 = arith.constant 0 : index
    %39 = vector.load %arg1[%c0_10, %c0_11] : memref<128x384xbf16, #tpu.memory_space<vmem>>, vector<128x384xbf16>
    %cst_12 = arith.constant dense<0.000000e+00> : vector<8x384xf32>
    %40 = tpu.matmul %38, %39, %cst_12 {dimension_numbers = #tpu.dot_dimension_numbers<[1], [0], [0], [1], [0, 0, 1, 1], [], []>} : vector<8x128xbf16>, vector<128x384xbf16>, vector<8x384xf32> -> vector<8x384xf32>
    %41 = vector.extract_strided_slice %37 {offsets = [0, 0], sizes = [8, 128], strides = [1, 1]} : vector<8x384xf32> to vector<8x128xf32>
    %42 = vector.extract_strided_slice %40 {offsets = [0, 0], sizes = [8, 128], strides = [1, 1]} : vector<8x384xf32> to vector<8x128xf32>
    %43 = arith.addf %41, %42 : vector<8x128xf32>
    %44 = arith.negf %43 : vector<8x128xf32>
    %45 = math.exp %44 : vector<8x128xf32>
    %cst_13 = arith.constant 1.000000e+00 : f32
    %46 = vector.broadcast %cst_13 : f32 to vector<8x128xf32>
    %47 = arith.addf %46, %45 : vector<8x128xf32>
    %48 = arith.divf %46, %47 : vector<8x128xf32>
    %49 = vector.extract_strided_slice %37 {offsets = [0, 128], sizes = [8, 128], strides = [1, 1]} : vector<8x384xf32> to vector<8x128xf32>
    %50 = vector.extract_strided_slice %40 {offsets = [0, 128], sizes = [8, 128], strides = [1, 1]} : vector<8x384xf32> to vector<8x128xf32>
    %51 = arith.addf %49, %50 : vector<8x128xf32>
    %52 = arith.negf %51 : vector<8x128xf32>
    %53 = math.exp %52 : vector<8x128xf32>
    %cst_14 = arith.constant 1.000000e+00 : f32
    %54 = vector.broadcast %cst_14 : f32 to vector<8x128xf32>
    %55 = arith.addf %54, %53 : vector<8x128xf32>
    %56 = arith.divf %54, %55 : vector<8x128xf32>
    %57 = vector.extract_strided_slice %37 {offsets = [0, 256], sizes = [8, 128], strides = [1, 1]} : vector<8x384xf32> to vector<8x128xf32>
    %58 = vector.extract_strided_slice %40 {offsets = [0, 256], sizes = [8, 128], strides = [1, 1]} : vector<8x384xf32> to vector<8x128xf32>
    %59 = arith.addf %58, %2 : vector<8x128xf32>
    %60 = arith.mulf %48, %59 : vector<8x128xf32>
    %61 = arith.addf %57, %60 : vector<8x128xf32>
    %62 = math.tanh %61 : vector<8x128xf32>
    %63 = arith.subf %34, %62 : vector<8x128xf32>
    %64 = arith.mulf %56, %63 : vector<8x128xf32>
    %65 = arith.addf %62, %64 : vector<8x128xf32>
    %c2_i32 = arith.constant 2 : i32
    %66 = arith.index_cast %c2_i32 : i32 to index
    %c0_15 = arith.constant 0 : index
    %c0_16 = arith.constant 0 : index
    %67 = vector.load %arg0[%66, %c0_15, %c0_16] : memref<8x8x384xf32, #tpu.memory_space<vmem>>, vector<1x8x384xf32>
    %68 = vector.shape_cast %67 : vector<1x8x384xf32> to vector<8x384xf32>
    %69 = arith.truncf %65 : vector<8x128xf32> to vector<8x128xbf16>
    %c0_17 = arith.constant 0 : index
    %c0_18 = arith.constant 0 : index
    %70 = vector.load %arg1[%c0_17, %c0_18] : memref<128x384xbf16, #tpu.memory_space<vmem>>, vector<128x384xbf16>
    %cst_19 = arith.constant dense<0.000000e+00> : vector<8x384xf32>
    %71 = tpu.matmul %69, %70, %cst_19 {dimension_numbers = #tpu.dot_dimension_numbers<[1], [0], [0], [1], [0, 0, 1, 1], [], []>} : vector<8x128xbf16>, vector<128x384xbf16>, vector<8x384xf32> -> vector<8x384xf32>
    %72 = vector.extract_strided_slice %68 {offsets = [0, 0], sizes = [8, 128], strides = [1, 1]} : vector<8x384xf32> to vector<8x128xf32>
    %73 = vector.extract_strided_slice %71 {offsets = [0, 0], sizes = [8, 128], strides = [1, 1]} : vector<8x384xf32> to vector<8x128xf32>
    %74 = arith.addf %72, %73 : vector<8x128xf32>
    %75 = arith.negf %74 : vector<8x128xf32>
    %76 = math.exp %75 : vector<8x128xf32>
    %cst_20 = arith.constant 1.000000e+00 : f32
    %77 = vector.broadcast %cst_20 : f32 to vector<8x128xf32>
    %78 = arith.addf %77, %76 : vector<8x128xf32>
    %79 = arith.divf %77, %78 : vector<8x128xf32>
    %80 = vector.extract_strided_slice %68 {offsets = [0, 128], sizes = [8, 128], strides = [1, 1]} : vector<8x384xf32> to vector<8x128xf32>
    %81 = vector.extract_strided_slice %71 {offsets = [0, 128], sizes = [8, 128], strides = [1, 1]} : vector<8x384xf32> to vector<8x128xf32>
    %82 = arith.addf %80, %81 : vector<8x128xf32>
    %83 = arith.negf %82 : vector<8x128xf32>
    %84 = math.exp %83 : vector<8x128xf32>
    %cst_21 = arith.constant 1.000000e+00 : f32
    %85 = vector.broadcast %cst_21 : f32 to vector<8x128xf32>
    %86 = arith.addf %85, %84 : vector<8x128xf32>
    %87 = arith.divf %85, %86 : vector<8x128xf32>
    %88 = vector.extract_strided_slice %68 {offsets = [0, 256], sizes = [8, 128], strides = [1, 1]} : vector<8x384xf32> to vector<8x128xf32>
    %89 = vector.extract_strided_slice %71 {offsets = [0, 256], sizes = [8, 128], strides = [1, 1]} : vector<8x384xf32> to vector<8x128xf32>
    %90 = arith.addf %89, %2 : vector<8x128xf32>
    %91 = arith.mulf %79, %90 : vector<8x128xf32>
    %92 = arith.addf %88, %91 : vector<8x128xf32>
    %93 = math.tanh %92 : vector<8x128xf32>
    %94 = arith.subf %65, %93 : vector<8x128xf32>
    %95 = arith.mulf %87, %94 : vector<8x128xf32>
    %96 = arith.addf %93, %95 : vector<8x128xf32>
    %c3_i32 = arith.constant 3 : i32
    %97 = arith.index_cast %c3_i32 : i32 to index
    %c0_22 = arith.constant 0 : index
    %c0_23 = arith.constant 0 : index
    %98 = vector.load %arg0[%97, %c0_22, %c0_23] : memref<8x8x384xf32, #tpu.memory_space<vmem>>, vector<1x8x384xf32>
    %99 = vector.shape_cast %98 : vector<1x8x384xf32> to vector<8x384xf32>
    %100 = arith.truncf %96 : vector<8x128xf32> to vector<8x128xbf16>
    %c0_24 = arith.constant 0 : index
    %c0_25 = arith.constant 0 : index
    %101 = vector.load %arg1[%c0_24, %c0_25] : memref<128x384xbf16, #tpu.memory_space<vmem>>, vector<128x384xbf16>
    %cst_26 = arith.constant dense<0.000000e+00> : vector<8x384xf32>
    %102 = tpu.matmul %100, %101, %cst_26 {dimension_numbers = #tpu.dot_dimension_numbers<[1], [0], [0], [1], [0, 0, 1, 1], [], []>} : vector<8x128xbf16>, vector<128x384xbf16>, vector<8x384xf32> -> vector<8x384xf32>
    %103 = vector.extract_strided_slice %99 {offsets = [0, 0], sizes = [8, 128], strides = [1, 1]} : vector<8x384xf32> to vector<8x128xf32>
    %104 = vector.extract_strided_slice %102 {offsets = [0, 0], sizes = [8, 128], strides = [1, 1]} : vector<8x384xf32> to vector<8x128xf32>
    %105 = arith.addf %103, %104 : vector<8x128xf32>
    %106 = arith.negf %105 : vector<8x128xf32>
    %107 = math.exp %106 : vector<8x128xf32>
    %cst_27 = arith.constant 1.000000e+00 : f32
    %108 = vector.broadcast %cst_27 : f32 to vector<8x128xf32>
    %109 = arith.addf %108, %107 : vector<8x128xf32>
    %110 = arith.divf %108, %109 : vector<8x128xf32>
    %111 = vector.extract_strided_slice %99 {offsets = [0, 128], sizes = [8, 128], strides = [1, 1]} : vector<8x384xf32> to vector<8x128xf32>
    %112 = vector.extract_strided_slice %102 {offsets = [0, 128], sizes = [8, 128], strides = [1, 1]} : vector<8x384xf32> to vector<8x128xf32>
    %113 = arith.addf %111, %112 : vector<8x128xf32>
    %114 = arith.negf %113 : vector<8x128xf32>
    %115 = math.exp %114 : vector<8x128xf32>
    %cst_28 = arith.constant 1.000000e+00 : f32
    %116 = vector.broadcast %cst_28 : f32 to vector<8x128xf32>
    %117 = arith.addf %116, %115 : vector<8x128xf32>
    %118 = arith.divf %116, %117 : vector<8x128xf32>
    %119 = vector.extract_strided_slice %99 {offsets = [0, 256], sizes = [8, 128], strides = [1, 1]} : vector<8x384xf32> to vector<8x128xf32>
    %120 = vector.extract_strided_slice %102 {offsets = [0, 256], sizes = [8, 128], strides = [1, 1]} : vector<8x384xf32> to vector<8x128xf32>
    %121 = arith.addf %120, %2 : vector<8x128xf32>
    %122 = arith.mulf %110, %121 : vector<8x128xf32>
    %123 = arith.addf %119, %122 : vector<8x128xf32>
    %124 = math.tanh %123 : vector<8x128xf32>
    %125 = arith.subf %96, %124 : vector<8x128xf32>
    %126 = arith.mulf %118, %125 : vector<8x128xf32>
    %127 = arith.addf %124, %126 : vector<8x128xf32>
    %c4_i32 = arith.constant 4 : i32
    %128 = arith.index_cast %c4_i32 : i32 to index
    %c0_29 = arith.constant 0 : index
    %c0_30 = arith.constant 0 : index
    %129 = vector.load %arg0[%128, %c0_29, %c0_30] : memref<8x8x384xf32, #tpu.memory_space<vmem>>, vector<1x8x384xf32>
    %130 = vector.shape_cast %129 : vector<1x8x384xf32> to vector<8x384xf32>
    %131 = arith.truncf %127 : vector<8x128xf32> to vector<8x128xbf16>
    %c0_31 = arith.constant 0 : index
    %c0_32 = arith.constant 0 : index
    %132 = vector.load %arg1[%c0_31, %c0_32] : memref<128x384xbf16, #tpu.memory_space<vmem>>, vector<128x384xbf16>
    %cst_33 = arith.constant dense<0.000000e+00> : vector<8x384xf32>
    %133 = tpu.matmul %131, %132, %cst_33 {dimension_numbers = #tpu.dot_dimension_numbers<[1], [0], [0], [1], [0, 0, 1, 1], [], []>} : vector<8x128xbf16>, vector<128x384xbf16>, vector<8x384xf32> -> vector<8x384xf32>
    %134 = vector.extract_strided_slice %130 {offsets = [0, 0], sizes = [8, 128], strides = [1, 1]} : vector<8x384xf32> to vector<8x128xf32>
    %135 = vector.extract_strided_slice %133 {offsets = [0, 0], sizes = [8, 128], strides = [1, 1]} : vector<8x384xf32> to vector<8x128xf32>
    %136 = arith.addf %134, %135 : vector<8x128xf32>
    %137 = arith.negf %136 : vector<8x128xf32>
    %138 = math.exp %137 : vector<8x128xf32>
    %cst_34 = arith.constant 1.000000e+00 : f32
    %139 = vector.broadcast %cst_34 : f32 to vector<8x128xf32>
    %140 = arith.addf %139, %138 : vector<8x128xf32>
    %141 = arith.divf %139, %140 : vector<8x128xf32>
    %142 = vector.extract_strided_slice %130 {offsets = [0, 128], sizes = [8, 128], strides = [1, 1]} : vector<8x384xf32> to vector<8x128xf32>
    %143 = vector.extract_strided_slice %133 {offsets = [0, 128], sizes = [8, 128], strides = [1, 1]} : vector<8x384xf32> to vector<8x128xf32>
    %144 = arith.addf %142, %143 : vector<8x128xf32>
    %145 = arith.negf %144 : vector<8x128xf32>
    %146 = math.exp %145 : vector<8x128xf32>
    %cst_35 = arith.constant 1.000000e+00 : f32
    %147 = vector.broadcast %cst_35 : f32 to vector<8x128xf32>
    %148 = arith.addf %147, %146 : vector<8x128xf32>
    %149 = arith.divf %147, %148 : vector<8x128xf32>
    %150 = vector.extract_strided_slice %130 {offsets = [0, 256], sizes = [8, 128], strides = [1, 1]} : vector<8x384xf32> to vector<8x128xf32>
    %151 = vector.extract_strided_slice %133 {offsets = [0, 256], sizes = [8, 128], strides = [1, 1]} : vector<8x384xf32> to vector<8x128xf32>
    %152 = arith.addf %151, %2 : vector<8x128xf32>
    %153 = arith.mulf %141, %152 : vector<8x128xf32>
    %154 = arith.addf %150, %153 : vector<8x128xf32>
    %155 = math.tanh %154 : vector<8x128xf32>
    %156 = arith.subf %127, %155 : vector<8x128xf32>
    %157 = arith.mulf %149, %156 : vector<8x128xf32>
    %158 = arith.addf %155, %157 : vector<8x128xf32>
    %c5_i32 = arith.constant 5 : i32
    %159 = arith.index_cast %c5_i32 : i32 to index
    %c0_36 = arith.constant 0 : index
    %c0_37 = arith.constant 0 : index
    %160 = vector.load %arg0[%159, %c0_36, %c0_37] : memref<8x8x384xf32, #tpu.memory_space<vmem>>, vector<1x8x384xf32>
    %161 = vector.shape_cast %160 : vector<1x8x384xf32> to vector<8x384xf32>
    %162 = arith.truncf %158 : vector<8x128xf32> to vector<8x128xbf16>
    %c0_38 = arith.constant 0 : index
    %c0_39 = arith.constant 0 : index
    %163 = vector.load %arg1[%c0_38, %c0_39] : memref<128x384xbf16, #tpu.memory_space<vmem>>, vector<128x384xbf16>
    %cst_40 = arith.constant dense<0.000000e+00> : vector<8x384xf32>
    %164 = tpu.matmul %162, %163, %cst_40 {dimension_numbers = #tpu.dot_dimension_numbers<[1], [0], [0], [1], [0, 0, 1, 1], [], []>} : vector<8x128xbf16>, vector<128x384xbf16>, vector<8x384xf32> -> vector<8x384xf32>
    %165 = vector.extract_strided_slice %161 {offsets = [0, 0], sizes = [8, 128], strides = [1, 1]} : vector<8x384xf32> to vector<8x128xf32>
    %166 = vector.extract_strided_slice %164 {offsets = [0, 0], sizes = [8, 128], strides = [1, 1]} : vector<8x384xf32> to vector<8x128xf32>
    %167 = arith.addf %165, %166 : vector<8x128xf32>
    %168 = arith.negf %167 : vector<8x128xf32>
    %169 = math.exp %168 : vector<8x128xf32>
    %cst_41 = arith.constant 1.000000e+00 : f32
    %170 = vector.broadcast %cst_41 : f32 to vector<8x128xf32>
    %171 = arith.addf %170, %169 : vector<8x128xf32>
    %172 = arith.divf %170, %171 : vector<8x128xf32>
    %173 = vector.extract_strided_slice %161 {offsets = [0, 128], sizes = [8, 128], strides = [1, 1]} : vector<8x384xf32> to vector<8x128xf32>
    %174 = vector.extract_strided_slice %164 {offsets = [0, 128], sizes = [8, 128], strides = [1, 1]} : vector<8x384xf32> to vector<8x128xf32>
    %175 = arith.addf %173, %174 : vector<8x128xf32>
    %176 = arith.negf %175 : vector<8x128xf32>
    %177 = math.exp %176 : vector<8x128xf32>
    %cst_42 = arith.constant 1.000000e+00 : f32
    %178 = vector.broadcast %cst_42 : f32 to vector<8x128xf32>
    %179 = arith.addf %178, %177 : vector<8x128xf32>
    %180 = arith.divf %178, %179 : vector<8x128xf32>
    %181 = vector.extract_strided_slice %161 {offsets = [0, 256], sizes = [8, 128], strides = [1, 1]} : vector<8x384xf32> to vector<8x128xf32>
    %182 = vector.extract_strided_slice %164 {offsets = [0, 256], sizes = [8, 128], strides = [1, 1]} : vector<8x384xf32> to vector<8x128xf32>
    %183 = arith.addf %182, %2 : vector<8x128xf32>
    %184 = arith.mulf %172, %183 : vector<8x128xf32>
    %185 = arith.addf %181, %184 : vector<8x128xf32>
    %186 = math.tanh %185 : vector<8x128xf32>
    %187 = arith.subf %158, %186 : vector<8x128xf32>
    %188 = arith.mulf %180, %187 : vector<8x128xf32>
    %189 = arith.addf %186, %188 : vector<8x128xf32>
    %c6_i32 = arith.constant 6 : i32
    %190 = arith.index_cast %c6_i32 : i32 to index
    %c0_43 = arith.constant 0 : index
    %c0_44 = arith.constant 0 : index
    %191 = vector.load %arg0[%190, %c0_43, %c0_44] : memref<8x8x384xf32, #tpu.memory_space<vmem>>, vector<1x8x384xf32>
    %192 = vector.shape_cast %191 : vector<1x8x384xf32> to vector<8x384xf32>
    %193 = arith.truncf %189 : vector<8x128xf32> to vector<8x128xbf16>
    %c0_45 = arith.constant 0 : index
    %c0_46 = arith.constant 0 : index
    %194 = vector.load %arg1[%c0_45, %c0_46] : memref<128x384xbf16, #tpu.memory_space<vmem>>, vector<128x384xbf16>
    %cst_47 = arith.constant dense<0.000000e+00> : vector<8x384xf32>
    %195 = tpu.matmul %193, %194, %cst_47 {dimension_numbers = #tpu.dot_dimension_numbers<[1], [0], [0], [1], [0, 0, 1, 1], [], []>} : vector<8x128xbf16>, vector<128x384xbf16>, vector<8x384xf32> -> vector<8x384xf32>
    %196 = vector.extract_strided_slice %192 {offsets = [0, 0], sizes = [8, 128], strides = [1, 1]} : vector<8x384xf32> to vector<8x128xf32>
    %197 = vector.extract_strided_slice %195 {offsets = [0, 0], sizes = [8, 128], strides = [1, 1]} : vector<8x384xf32> to vector<8x128xf32>
    %198 = arith.addf %196, %197 : vector<8x128xf32>
    %199 = arith.negf %198 : vector<8x128xf32>
    %200 = math.exp %199 : vector<8x128xf32>
    %cst_48 = arith.constant 1.000000e+00 : f32
    %201 = vector.broadcast %cst_48 : f32 to vector<8x128xf32>
    %202 = arith.addf %201, %200 : vector<8x128xf32>
    %203 = arith.divf %201, %202 : vector<8x128xf32>
    %204 = vector.extract_strided_slice %192 {offsets = [0, 128], sizes = [8, 128], strides = [1, 1]} : vector<8x384xf32> to vector<8x128xf32>
    %205 = vector.extract_strided_slice %195 {offsets = [0, 128], sizes = [8, 128], strides = [1, 1]} : vector<8x384xf32> to vector<8x128xf32>
    %206 = arith.addf %204, %205 : vector<8x128xf32>
    %207 = arith.negf %206 : vector<8x128xf32>
    %208 = math.exp %207 : vector<8x128xf32>
    %cst_49 = arith.constant 1.000000e+00 : f32
    %209 = vector.broadcast %cst_49 : f32 to vector<8x128xf32>
    %210 = arith.addf %209, %208 : vector<8x128xf32>
    %211 = arith.divf %209, %210 : vector<8x128xf32>
    %212 = vector.extract_strided_slice %192 {offsets = [0, 256], sizes = [8, 128], strides = [1, 1]} : vector<8x384xf32> to vector<8x128xf32>
    %213 = vector.extract_strided_slice %195 {offsets = [0, 256], sizes = [8, 128], strides = [1, 1]} : vector<8x384xf32> to vector<8x128xf32>
    %214 = arith.addf %213, %2 : vector<8x128xf32>
    %215 = arith.mulf %203, %214 : vector<8x128xf32>
    %216 = arith.addf %212, %215 : vector<8x128xf32>
    %217 = math.tanh %216 : vector<8x128xf32>
    %218 = arith.subf %189, %217 : vector<8x128xf32>
    %219 = arith.mulf %211, %218 : vector<8x128xf32>
    %220 = arith.addf %217, %219 : vector<8x128xf32>
    %c7_i32 = arith.constant 7 : i32
    %221 = arith.index_cast %c7_i32 : i32 to index
    %c0_50 = arith.constant 0 : index
    %c0_51 = arith.constant 0 : index
    %222 = vector.load %arg0[%221, %c0_50, %c0_51] : memref<8x8x384xf32, #tpu.memory_space<vmem>>, vector<1x8x384xf32>
    %223 = vector.shape_cast %222 : vector<1x8x384xf32> to vector<8x384xf32>
    %224 = arith.truncf %220 : vector<8x128xf32> to vector<8x128xbf16>
    %c0_52 = arith.constant 0 : index
    %c0_53 = arith.constant 0 : index
    %225 = vector.load %arg1[%c0_52, %c0_53] : memref<128x384xbf16, #tpu.memory_space<vmem>>, vector<128x384xbf16>
    %cst_54 = arith.constant dense<0.000000e+00> : vector<8x384xf32>
    %226 = tpu.matmul %224, %225, %cst_54 {dimension_numbers = #tpu.dot_dimension_numbers<[1], [0], [0], [1], [0, 0, 1, 1], [], []>} : vector<8x128xbf16>, vector<128x384xbf16>, vector<8x384xf32> -> vector<8x384xf32>
    %227 = vector.extract_strided_slice %223 {offsets = [0, 0], sizes = [8, 128], strides = [1, 1]} : vector<8x384xf32> to vector<8x128xf32>
    %228 = vector.extract_strided_slice %226 {offsets = [0, 0], sizes = [8, 128], strides = [1, 1]} : vector<8x384xf32> to vector<8x128xf32>
    %229 = arith.addf %227, %228 : vector<8x128xf32>
    %230 = arith.negf %229 : vector<8x128xf32>
    %231 = math.exp %230 : vector<8x128xf32>
    %cst_55 = arith.constant 1.000000e+00 : f32
    %232 = vector.broadcast %cst_55 : f32 to vector<8x128xf32>
    %233 = arith.addf %232, %231 : vector<8x128xf32>
    %234 = arith.divf %232, %233 : vector<8x128xf32>
    %235 = vector.extract_strided_slice %223 {offsets = [0, 128], sizes = [8, 128], strides = [1, 1]} : vector<8x384xf32> to vector<8x128xf32>
    %236 = vector.extract_strided_slice %226 {offsets = [0, 128], sizes = [8, 128], strides = [1, 1]} : vector<8x384xf32> to vector<8x128xf32>
    %237 = arith.addf %235, %236 : vector<8x128xf32>
    %238 = arith.negf %237 : vector<8x128xf32>
    %239 = math.exp %238 : vector<8x128xf32>
    %cst_56 = arith.constant 1.000000e+00 : f32
    %240 = vector.broadcast %cst_56 : f32 to vector<8x128xf32>
    %241 = arith.addf %240, %239 : vector<8x128xf32>
    %242 = arith.divf %240, %241 : vector<8x128xf32>
    %243 = vector.extract_strided_slice %223 {offsets = [0, 256], sizes = [8, 128], strides = [1, 1]} : vector<8x384xf32> to vector<8x128xf32>
    %244 = vector.extract_strided_slice %226 {offsets = [0, 256], sizes = [8, 128], strides = [1, 1]} : vector<8x384xf32> to vector<8x128xf32>
    %245 = arith.addf %244, %2 : vector<8x128xf32>
    %246 = arith.mulf %234, %245 : vector<8x128xf32>
    %247 = arith.addf %243, %246 : vector<8x128xf32>
    %248 = math.tanh %247 : vector<8x128xf32>
    %249 = arith.subf %220, %248 : vector<8x128xf32>
    %250 = arith.mulf %242, %249 : vector<8x128xf32>
    %251 = arith.addf %248, %250 : vector<8x128xf32>
    %c8_i32 = arith.constant 8 : i32
    %252 = arith.truncf %251 : vector<8x128xf32> to vector<8x128xbf16>
    %c0_57 = arith.constant 0 : index
    %c0_58 = arith.constant 0 : index
    %253 = vector.load %arg3[%c0_57, %c0_58] : memref<128x128xbf16, #tpu.memory_space<vmem>>, vector<128x128xbf16>
    %cst_59 = arith.constant dense<0.000000e+00> : vector<8x128xf32>
    %254 = tpu.matmul %252, %253, %cst_59 {dimension_numbers = #tpu.dot_dimension_numbers<[1], [0], [0], [1], [0, 0, 1, 1], [], []>} : vector<8x128xbf16>, vector<128x128xbf16>, vector<8x128xf32> -> vector<8x128xf32>
    %c0_60 = arith.constant 0 : index
    %c0_61 = arith.constant 0 : index
    %255 = vector.load %arg4[%c0_60, %c0_61] : memref<1x128xf32, #tpu.memory_space<vmem>>, vector<1x128xf32>
    %256 = vector.broadcast %255 : vector<1x128xf32> to vector<8x128xf32>
    %257 = arith.addf %254, %256 : vector<8x128xf32>
    %c0_62 = arith.constant 0 : index
    %c0_63 = arith.constant 0 : index
    %258 = vector.load %arg5[%c0_62, %c0_63] : memref<8x128xf32, #tpu.memory_space<vmem>>, vector<8x128xf32>
    tpu.vector_store %arg5[%c0_62, %c0_63], %257 {strides = array<i32>} : memref<8x128xf32, #tpu.memory_space<vmem>>, vector<8x128xf32>,
    return
  }
}

</mosaic_0001>

<bundles_post_ra>
// kernel: naive_gru_forward.1
= control target key start
LH: loop header
LB: loop body
LE: loop exit
PB: predicated region body
PF: predicated region fallthrough
CT: control target
= control target key end

     0   :  { %v1656_v2 = vmov 0.0   ;;  %v1657_v3 = vmov 0   ;;  %vm1658_vm0 = vmmov 0   ;;  %s2268_s0 = inlined_call_operand.vmem [shape: f32[8,8,384], index: 0, kind: input, shape index: {}]   ;;  %s2269_s1 = inlined_call_operand.vmem [shape: bf16[128,384], index: 1, kind: input, shape index: {}]   ;;  %s2270_s2 = inlined_call_operand.vmem [shape: f32[1,128], index: 2, kind: input, shape index: {}]   ;;  %s2271_s3 = inlined_call_operand.vmem [shape: bf16[128,128], index: 3, kind: input, shape index: {}]   ;;  %s2272_s4 = inlined_call_operand.vmem [shape: f32[1,128], index: 4, kind: input, shape index: {}]   ;;  %s2273_s5 = inlined_call_operand.hbm [shape: f32[8,128], index: 5, kind: output, shape index: {}]  }
   0x1   :  { %v1693_v0 = vld [vmem:[%s2269_s1 + $0x4] ss:$12 sps:$4 sm:$0xff]   ;;  %v1698_v1 = vld [vmem:[%s2269_s1] ss:$12 sps:$4 sm:$0xff]   ;;  %1322 = vmatprep.subr.bf16.mxu1 %v1656_v2  ;;  %224 = vmatprep.mubr.bf16.mxu0 %v1657_v3  ;;  %v1706_v4 = vld [vmem:[%s2269_s1 + $0x1c] ss:$12 sps:$4 sm:$0xff]  }
   0x2   :  { %192 = vmatprep.subr.bf16.mxu0 %v1693_v0  ;;  %1338 = vmatprep.mubr.msk.bf16.mxu1 %vm1658_vm0, %v1656_v2  ;;  %v1714_v5 = vld [vmem:[%s2269_s1 + $0x18] ss:$12 sps:$4 sm:$0xff]   ;;  %v1720_v6 = vld [vmem:[%s2269_s1 + $0x34] ss:$12 sps:$4 sm:$0xff]   ;;  %v1726_v7 = vld [vmem:[%s2269_s1 + $0x30] ss:$12 sps:$4 sm:$0xff]  }
   0x3   :  { %193 = vmatpush1.bf16.msra.mxu0 %v1698_v1  ;;  %v1732_v8 = vld [vmem:[%s2269_s1 + $0x4c] ss:$12 sps:$4 sm:$0xff]   ;;  %v1737_v9 = vld [vmem:[%s2269_s1 + $0x8] ss:$12 sps:$4 sm:$0xff]   ;;  %v1750_v11 = vld [vmem:[%s2269_s1 + $0x64] ss:$12 sps:$4 sm:$0xff]  }
   0x4   :  { %194 = vmatprep.subr.bf16.mxu0 %v1706_v4  ;;  %v1743_v10 = vld [vmem:[%s2269_s1 + $0x48] ss:$12 sps:$4 sm:$0xff]   ;;  %1323 = vmatpush3.bf16.msra.mxu1 %v1737_v9  ;;  %v1756_v12 = vld [vmem:[%s2269_s1 + $0x20] ss:$12 sps:$4 sm:$0xff]   ;;  %v1768_v14 = vld [vmem:[%s2269_s1 + $0x38] ss:$12 sps:$4 sm:$0xff]  }
   0x5   :  { %1324 = vmatprep.subr.bf16.mxu1 %v1656_v2  ;;  %v1761_v13 = vld [vmem:[%s2269_s1 + $0x60] ss:$12 sps:$4 sm:$0xff]   ;;  %v1774_v15 = vld [vmem:[%s2269_s1 + $0x7c] ss:$12 sps:$4 sm:$0xff]   ;;  %v1780_v16 = vld [vmem:[%s2269_s1 + $0x78] ss:$12 sps:$4 sm:$0xff]  }
   0x6   :  { %v1785_v17 = vld [vmem:[%s2269_s1 + $0x94] ss:$12 sps:$4 sm:$0xff]   ;;  %v1790_v18 = vld [vmem:[%s2269_s1 + $0x50] ss:$12 sps:$4 sm:$0xff]   ;;  %v1812_v21 = vld [vmem:[%s2269_s1 + $0xac] ss:$12 sps:$4 sm:$0xff]  }
   0x7   :  { %195 = vmatpush1.bf16.msra.mxu0 %v1714_v5  ;;  %v1799_v19 = vld [vmem:[%s2269_s1 + $0x90] ss:$12 sps:$4 sm:$0xff]   ;;  %v1804_v20 = vld [vmem:[%s2269_s1 + $0x68] ss:$12 sps:$4 sm:$0xff]  }
   0x8   :  { %196 = vmatprep.subr.bf16.mxu0 %v1720_v6  ;;  %1325 = vmatpush3.bf16.msra.mxu1 %v1756_v12 }
   0x9   :  { %1326 = vmatprep.subr.bf16.mxu1 %v1656_v2 }
   0xb   :  { %197 = vmatpush1.bf16.msra.mxu0 %v1726_v7 }
   0xc   :  { %198 = vmatprep.subr.bf16.mxu0 %v1732_v8  ;;  %1327 = vmatpush3.bf16.msra.mxu1 %v1768_v14 }
   0xd   :  { %1328 = vmatprep.subr.bf16.mxu1 %v1656_v2 }
   0xf   :  { %199 = vmatpush1.bf16.msra.mxu0 %v1743_v10 }
  0x10   :  { %200 = vmatprep.subr.bf16.mxu0 %v1750_v11  ;;  %1329 = vmatpush3.bf16.msra.mxu1 %v1790_v18 }
  0x11   :  { %1330 = vmatprep.subr.bf16.mxu1 %v1656_v2 }
  0x13   :  { %201 = vmatpush1.bf16.msra.mxu0 %v1761_v13 }
  0x14   :  { %202 = vmatprep.subr.bf16.mxu0 %v1774_v15 }
  0x17   :  { %203 = vmatpush1.bf16.msra.mxu0 %v1780_v16 }
  0x18   :  { %204 = vmatprep.subr.bf16.mxu0 %v1785_v17 }
  0x19   :  { %10 = vsyncpa [#allocation3], 0  ;;  %v1819_v22 = vld [vmem:[%s2269_s1 + $0xa8] ss:$12 sps:$4 sm:$0xff]   ;;  %1331 = vmatpush3.bf16.msra.mxu1 %v1804_v20  ;;  %v1825_v23 = vld [vmem:[%s2269_s1 + $0x80] ss:$12 sps:$4 sm:$0xff]  }
  0x1a   :  { %1332 = vmatprep.subr.bf16.mxu1 %v1656_v2  ;;  %v1834_v24 = vld [vmem:[%s2269_s1 + $0x98] ss:$12 sps:$4 sm:$0xff]   ;;  %v1843_v25 = vld [vmem:[%s2269_s1 + $0xb0] ss:$12 sps:$4 sm:$0xff]   ;;  %v30_v33 = vld [vmem:[%s2268_s0 + $0x8] sm:$0xff]  ;;  %s1659_s15 = smov [#allocation2]  }
  0x1b   :  { %205 = vmatpush1.bf16.msra.mxu0 %v1799_v19  ;;  %v29_v26 = vld [vmem:[%s2268_s0] sm:$0xff]  ;;  %v31_v46 = vld [vmem:[%s2268_s0 + $0x10] sm:$0xff]  ;;  %v1197_v56 = vld [vmem:[%s2268_s0 + $0x18] sm:$0xff]  ;;  %s1162_s16 = sshll.u32 %s1659_s15, 4  ;;  %s1163_s16 = int_to_ptr.vmem [resolvable:$true] %s1162_s16 }
  0x1c   :  { %206 = vmatprep.subr.bf16.mxu0 %v1812_v21  ;;  %v1893_v42 = vld [vmem:[%s2270_s2] ss:$0 sm:$0xff]  ;;  %p1637_p1 = scmp.lt.s32.totalorder %s1163_s16, %s1163_s16 }
  0x1d   :  { %1333 = vmatpush3.bf16.msra.mxu1 %v1825_v23 }
  0x1e   :  { %1334 = vmatprep.subr.bf16.mxu1 %v1656_v2 }
  0x1f   :  { %207 = vmatpush1.bf16.msra.mxu0 %v1819_v22 }
  0x20   :  { %299 = vmatprep.subr.bf16.mxu0 %v1693_v0 }
  0x21   :  { %1335 = vmatpush3.bf16.msra.mxu1 %v1834_v24 }
  0x22   :  { %225 = vmatmul.mubr.bf16.vlgmr.msra.gmra.mrb[0].mxu0 %v1657_v3  ;;  %1336 = vmatprep.subr.bf16.mxu1 %v1656_v2 }
  0x23   :  { %300 = vmatpush1.bf16.msra.mxu0 %v1698_v1  ;;  %331 = vmatprep.mubr.bf16.mxu0 %v1657_v3 }
  0x24   :  { %301 = vmatprep.subr.bf16.mxu0 %v1706_v4 }
  0x25   :  { %1337 = vmatpush3.bf16.msra.mxu1 %v1843_v25 }
  0x26   :  { %1342 = vmatprep.subr.bf16.mxu1 %v1656_v2 }
  0x27   :  { %302 = vmatpush1.bf16.msra.mxu0 %v1714_v5 }
  0x28   :  { %303 = vmatprep.subr.bf16.mxu0 %v1720_v6  ;;  %1339 = vmatmul.mubr.bf16.vlgmr.msra.gmra.mrb[0].mxu1 %v1657_v3 }
  0x29   :  { %1343 = vmatpush3.bf16.msra.mxu1 %v1737_v9  ;;  %1358 = vmatprep.mubr.msk.bf16.mxu1 %vm1658_vm0, %v1656_v2 }
  0x2a   :  { %1344 = vmatprep.subr.bf16.mxu1 %v1656_v2 }
  0x2b   :  { %304 = vmatpush1.bf16.msra.mxu0 %v1726_v7 }
  0x2c   :  { %305 = vmatprep.subr.bf16.mxu0 %v1732_v8 }
  0x2d   :  { %1345 = vmatpush3.bf16.msra.mxu1 %v1756_v12 }
  0x2e   :  { %1346 = vmatprep.subr.bf16.mxu1 %v1656_v2 }
  0x2f   :  { %306 = vmatpush1.bf16.msra.mxu0 %v1743_v10 }
  0x30   :  { %307 = vmatprep.subr.bf16.mxu0 %v1750_v11 }
  0x31   :  { %1347 = vmatpush3.bf16.msra.mxu1 %v1768_v14 }
  0x32   :  { %1348 = vmatprep.subr.bf16.mxu1 %v1656_v2 }
  0x33   :  { %308 = vmatpush1.bf16.msra.mxu0 %v1761_v13 }
  0x34   :  { %309 = vmatprep.subr.bf16.mxu0 %v1774_v15 }
  0x35   :  { %1349 = vmatpush3.bf16.msra.mxu1 %v1790_v18 }
  0x36   :  { %1350 = vmatprep.subr.bf16.mxu1 %v1656_v2 }
  0x37   :  { %310 = vmatpush1.bf16.msra.mxu0 %v1780_v16 }
  0x38   :  { %311 = vmatprep.subr.bf16.mxu0 %v1785_v17 }
  0x39   :  { %1351 = vmatpush3.bf16.msra.mxu1 %v1804_v20 }
  0x3a   :  { %1352 = vmatprep.subr.bf16.mxu1 %v1656_v2 }
  0x3b   :  { %312 = vmatpush1.bf16.msra.mxu0 %v1799_v19 }
  0x3c   :  { %313 = vmatprep.subr.bf16.mxu0 %v1812_v21 }
  0x3d   :  { %1353 = vmatpush3.bf16.msra.mxu1 %v1825_v23 }
  0x3e   :  { %1354 = vmatprep.subr.bf16.mxu1 %v1656_v2 }
  0x3f   :  { %314 = vmatpush1.bf16.msra.mxu0 %v1819_v22 }
  0x40   :  { %406 = vmatprep.subr.bf16.mxu0 %v1693_v0 }
  0x41   :  { %1355 = vmatpush3.bf16.msra.mxu1 %v1834_v24 }
  0x42   :  { %1356 = vmatprep.subr.bf16.mxu1 %v1656_v2 }
  0x45   :  { %1357 = vmatpush3.bf16.msra.mxu1 %v1843_v25 }
  0x46   :  { %1362 = vmatprep.subr.bf16.mxu1 %v1656_v2 }
  0xf5   :  { %v226_v27 = vpop.f32.mrb[0].mxu0 }
  0xf6   :  { %v273_v28 = vadd.f32 %v226_v27, %v29_v26  ;;  %v228_v29 = vpop.f32.mrb[1].mxu0 }
  0xf7   :  { %v230_v30 = vpop.f32.mrb[2].mxu0  ;;  %v280_v35 = vadd.f32 %v228_v29, %v30_v33  ;;  %v1198_v29 = vld [vmem:[%s2268_s0 + $0x20] sm:$0xff] }
  0xf8   :  { %v1195_v31 = vmul.f32 -1.442695, %v273_v28  ;;  %v231_v32 = vpop.f32.mrb[3].mxu0 }
  0xf9   :  { %v1196_v39 = vmul.f32 -1.442695, %v280_v35 }
  0xfa   :  { %1546 = vpow2.f32 %v1195_v31 }
  0xfb   :  { %v267_v34 = vpop.f32.mrb[0].mxu1  ;;  %1548 = vpow2.f32 %v1196_v39 }
  0xfc   :  { %v1340_v36 = vpop.f32.mrb[1].mxu1  ;;  %v287_v43 = vadd.f32 %v1893_v42, %v267_v34 }
  0xfd   :  { %v270_v37 = vpop.f32.mrb[2].mxu1 }
  0xfe   :  { %v1341_v38 = vpop.f32.mrb[3].mxu1  ;;  %v1199_v37 = vld [vmem:[%s2268_s0 + $0x28] sm:$0xff] }
 0x104   :  { %v1547_v40 = vpop.eup %1546 }
 0x105   :  { %v277_v41 = vadd.f32 1.0, %v1547_v40  ;;  %v1549_v44 = vpop.eup %1548 }
 0x106   :  { %v284_v48 = vadd.f32 1.0, %v1549_v44 }
 0x107   :  { %1550 = vrcp.f32 %v277_v41 }
 0x111   :  { %v1551_v45 = vpop.eup %1550 }
 0x112   :  { %v288_v47 = vmul.f32 %v1551_v45, %v287_v43 }
 0x114   :  { %v289_v49 = vadd.f32 %v288_v47, %v31_v46 }
 0x116   :  { %1552 = vtanh.f32 %v289_v49 }
 0x117   :  { %1554 = vrcp.f32 %v284_v48  ;;  %v1202_v48 = vld [vmem:[%s2268_s0 + $0x30] sm:$0xff] }
 0x120   :  { %v1553_v50 = vpop.eup %1552 }
 0x121   :  { %v291_v51 = vsub.f32 0.0, %v1553_v50  ;;  %v1555_v52 = vpop.eup %1554 }
 0x123   :  { %v292_v53 = vmul.f32 %v1555_v52, %v291_v51 }
 0x125   :  { %v1899_v54 = vadd.f32 %v1553_v50, %v292_v53 }
 0x127   :  { %v298_v55 = vpack.c.bf16 %v1899_v54, %v1899_v54 }
 0x129   :  { %332 = vmatmul.mubr.bf16.vlgmr.msra.gmra.mrb[4].mxu0 %v298_v55  ;;  %1359 = vmatmul.mubr.bf16.vlgmr.msra.gmra.mrb[4].mxu1 %v298_v55 }
 0x12a   :  { %407 = vmatpush1.bf16.msra.mxu0 %v1698_v1  ;;  %1363 = vmatpush3.bf16.msra.mxu1 %v1737_v9 }
 0x12b   :  { %408 = vmatprep.subr.bf16.mxu0 %v1706_v4  ;;  %1364 = vmatprep.subr.bf16.mxu1 %v1656_v2 }
 0x12c   :  { %438 = vmatprep.mubr.bf16.mxu0 %v1657_v3  ;;  %1378 = vmatprep.mubr.msk.bf16.mxu1 %vm1658_vm0, %v1656_v2 }
 0x12e   :  { %409 = vmatpush1.bf16.msra.mxu0 %v1714_v5  ;;  %1365 = vmatpush3.bf16.msra.mxu1 %v1756_v12 }
 0x12f   :  { %410 = vmatprep.subr.bf16.mxu0 %v1720_v6  ;;  %1366 = vmatprep.subr.bf16.mxu1 %v1656_v2 }
 0x132   :  { %411 = vmatpush1.bf16.msra.mxu0 %v1726_v7  ;;  %1367 = vmatpush3.bf16.msra.mxu1 %v1768_v14 }
 0x133   :  { %412 = vmatprep.subr.bf16.mxu0 %v1732_v8  ;;  %1368 = vmatprep.subr.bf16.mxu1 %v1656_v2 }
 0x136   :  { %413 = vmatpush1.bf16.msra.mxu0 %v1743_v10  ;;  %1369 = vmatpush3.bf16.msra.mxu1 %v1790_v18 }
 0x137   :  { %414 = vmatprep.subr.bf16.mxu0 %v1750_v11  ;;  %1370 = vmatprep.subr.bf16.mxu1 %v1656_v2 }
 0x13a   :  { %415 = vmatpush1.bf16.msra.mxu0 %v1761_v13  ;;  %1371 = vmatpush3.bf16.msra.mxu1 %v1804_v20 }
 0x13b   :  { %416 = vmatprep.subr.bf16.mxu0 %v1774_v15  ;;  %1372 = vmatprep.subr.bf16.mxu1 %v1656_v2 }
 0x13e   :  { %417 = vmatpush1.bf16.msra.mxu0 %v1780_v16  ;;  %1373 = vmatpush3.bf16.msra.mxu1 %v1825_v23 }
 0x13f   :  { %418 = vmatprep.subr.bf16.mxu0 %v1785_v17  ;;  %1374 = vmatprep.subr.bf16.mxu1 %v1656_v2 }
 0x142   :  { %419 = vmatpush1.bf16.msra.mxu0 %v1799_v19  ;;  %1375 = vmatpush3.bf16.msra.mxu1 %v1834_v24 }
 0x143   :  { %420 = vmatprep.subr.bf16.mxu0 %v1812_v21  ;;  %1376 = vmatprep.subr.bf16.mxu1 %v1656_v2 }
 0x146   :  { %421 = vmatpush1.bf16.msra.mxu0 %v1819_v22  ;;  %1377 = vmatpush3.bf16.msra.mxu1 %v1843_v25 }
 0x147   :  { %513 = vmatprep.subr.bf16.mxu0 %v1693_v0  ;;  %1382 = vmatprep.subr.bf16.mxu1 %v1656_v2 }
 0x1fc   :  { %v333_v57 = vpop.f32.mrb[4].mxu0  ;;  %v374_v58 = vpop.f32.mrb[4].mxu1 }
 0x1fd   :  { %v380_v59 = vadd.f32 %v1197_v56, %v333_v57  ;;  %v335_v60 = vpop.f32.mrb[5].mxu0  ;;  %v1360_v61 = vpop.f32.mrb[5].mxu1  ;;  %v394_v35 = vadd.f32 %v1893_v42, %v374_v58 }
 0x1fe   :  { %v337_v62 = vpop.f32.mrb[6].mxu0  ;;  %v377_v63 = vpop.f32.mrb[6].mxu1  ;;  %v387_v30 = vadd.f32 %v1198_v29, %v335_v60  ;;  %v1204_v29 = vld [vmem:[%s2268_s0 + $0x40] sm:$0xff] }
 0x1ff   :  { %v1200_v26 = vmul.f32 -1.442695, %v380_v59  ;;  %v338_v27 = vpop.f32.mrb[7].mxu0  ;;  %v1361_v28 = vpop.f32.mrb[7].mxu1  ;;  %v1203_v59 = vld [vmem:[%s2268_s0 + $0x38] sm:$0xff] }
 0x200   :  { %v1201_v31 = vmul.f32 -1.442695, %v387_v30 }
 0x201   :  { %1556 = vpow2.f32 %v1200_v26 }
 0x202   :  { %1558 = vpow2.f32 %v1201_v31 }
 0x20b   :  { %v1557_v32 = vpop.eup %1556 }
 0x20c   :  { %v384_v33 = vadd.f32 1.0, %v1557_v32  ;;  %v1559_v34 = vpop.eup %1558 }
 0x20d   :  { %v391_v40 = vadd.f32 1.0, %v1559_v34 }
 0x20e   :  { %1560 = vrcp.f32 %v384_v33 }
 0x218   :  { %v1561_v36 = vpop.eup %1560 }
 0x219   :  { %v395_v38 = vmul.f32 %v1561_v36, %v394_v35 }
 0x21b   :  { %v396_v39 = vadd.f32 %v1199_v37, %v395_v38 }
 0x21d   :  { %1562 = vtanh.f32 %v396_v39  ;;  %v1207_v39 = vld [vmem:[%s2268_s0 + $0x48] sm:$0xff] }
 0x21e   :  { %1564 = vrcp.f32 %v391_v40 }
 0x227   :  { %v1563_v41 = vpop.eup %1562 }
 0x228   :  { %v398_v43 = vsub.f32 %v1899_v54, %v1563_v41  ;;  %v1565_v44 = vpop.eup %1564 }
 0x22a   :  { %v399_v45 = vmul.f32 %v1565_v44, %v398_v43 }
 0x22c   :  { %v1949_v46 = vadd.f32 %v1563_v41, %v399_v45 }
 0x22e   :  { %v405_v47 = vpack.c.bf16 %v1949_v46, %v1949_v46 }
 0x230   :  { %439 = vmatmul.mubr.bf16.vlgmr.msra.gmra.mrb[8].mxu0 %v405_v47  ;;  %1379 = vmatmul.mubr.bf16.vlgmr.msra.gmra.mrb[8].mxu1 %v405_v47 }
 0x231   :  { %514 = vmatpush1.bf16.msra.mxu0 %v1698_v1  ;;  %1383 = vmatpush3.bf16.msra.mxu1 %v1737_v9 }
 0x232   :  { %515 = vmatprep.subr.bf16.mxu0 %v1706_v4  ;;  %1384 = vmatprep.subr.bf16.mxu1 %v1656_v2 }
 0x233   :  { %545 = vmatprep.mubr.bf16.mxu0 %v1657_v3  ;;  %1398 = vmatprep.mubr.msk.bf16.mxu1 %vm1658_vm0, %v1656_v2 }
 0x235   :  { %516 = vmatpush1.bf16.msra.mxu0 %v1714_v5  ;;  %1385 = vmatpush3.bf16.msra.mxu1 %v1756_v12 }
 0x236   :  { %517 = vmatprep.subr.bf16.mxu0 %v1720_v6  ;;  %1386 = vmatprep.subr.bf16.mxu1 %v1656_v2 }
 0x239   :  { %518 = vmatpush1.bf16.msra.mxu0 %v1726_v7  ;;  %1387 = vmatpush3.bf16.msra.mxu1 %v1768_v14 }
 0x23a   :  { %519 = vmatprep.subr.bf16.mxu0 %v1732_v8  ;;  %1388 = vmatprep.subr.bf16.mxu1 %v1656_v2 }
 0x23d   :  { %520 = vmatpush1.bf16.msra.mxu0 %v1743_v10  ;;  %1389 = vmatpush3.bf16.msra.mxu1 %v1790_v18 }
 0x23e   :  { %521 = vmatprep.subr.bf16.mxu0 %v1750_v11  ;;  %1390 = vmatprep.subr.bf16.mxu1 %v1656_v2 }
 0x241   :  { %522 = vmatpush1.bf16.msra.mxu0 %v1761_v13  ;;  %1391 = vmatpush3.bf16.msra.mxu1 %v1804_v20 }
 0x242   :  { %523 = vmatprep.subr.bf16.mxu0 %v1774_v15  ;;  %1392 = vmatprep.subr.bf16.mxu1 %v1656_v2 }
 0x245   :  { %524 = vmatpush1.bf16.msra.mxu0 %v1780_v16  ;;  %1393 = vmatpush3.bf16.msra.mxu1 %v1825_v23 }
 0x246   :  { %525 = vmatprep.subr.bf16.mxu0 %v1785_v17  ;;  %1394 = vmatprep.subr.bf16.mxu1 %v1656_v2 }
 0x249   :  { %526 = vmatpush1.bf16.msra.mxu0 %v1799_v19  ;;  %1395 = vmatpush3.bf16.msra.mxu1 %v1834_v24 }
 0x24a   :  { %527 = vmatprep.subr.bf16.mxu0 %v1812_v21  ;;  %1396 = vmatprep.subr.bf16.mxu1 %v1656_v2 }
 0x24d   :  { %528 = vmatpush1.bf16.msra.mxu0 %v1819_v22  ;;  %1397 = vmatpush3.bf16.msra.mxu1 %v1843_v25 }
 0x24e   :  { %620 = vmatprep.subr.bf16.mxu0 %v1693_v0  ;;  %1402 = vmatprep.subr.bf16.mxu1 %v1656_v2 }
 0x303   :  { %v440_v49 = vpop.f32.mrb[8].mxu0  ;;  %v481_v50 = vpop.f32.mrb[8].mxu1 }
 0x304   :  { %v487_v51 = vadd.f32 %v1202_v48, %v440_v49  ;;  %v442_v52 = vpop.f32.mrb[9].mxu0  ;;  %v1380_v53 = vpop.f32.mrb[9].mxu1  ;;  %v501_v27 = vadd.f32 %v1893_v42, %v481_v50 }
 0x305   :  { %v444_v54 = vpop.f32.mrb[10].mxu0  ;;  %v484_v55 = vpop.f32.mrb[10].mxu1  ;;  %v494_v60 = vadd.f32 %v1203_v59, %v442_v52  ;;  %v1209_v59 = vld [vmem:[%s2268_s0 + $0x58] sm:$0xff] }
 0x306   :  { %v1205_v56 = vmul.f32 -1.442695, %v487_v51  ;;  %v445_v57 = vpop.f32.mrb[11].mxu0  ;;  %v1381_v58 = vpop.f32.mrb[11].mxu1  ;;  %v1208_v51 = vld [vmem:[%s2268_s0 + $0x50] sm:$0xff] }
 0x307   :  { %v1206_v61 = vmul.f32 -1.442695, %v494_v60 }
 0x308   :  { %1566 = vpow2.f32 %v1205_v56 }
 0x309   :  { %1568 = vpow2.f32 %v1206_v61 }
 0x312   :  { %v1567_v62 = vpop.eup %1566 }
 0x313   :  { %v491_v63 = vadd.f32 1.0, %v1567_v62  ;;  %v1569_v26 = vpop.eup %1568 }
 0x314   :  { %v498_v32 = vadd.f32 1.0, %v1569_v26 }
 0x315   :  { %1570 = vrcp.f32 %v491_v63 }
 0x31f   :  { %v1571_v28 = vpop.eup %1570 }
 0x320   :  { %v502_v30 = vmul.f32 %v1571_v28, %v501_v27 }
 0x322   :  { %v503_v31 = vadd.f32 %v1204_v29, %v502_v30 }
 0x324   :  { %1572 = vtanh.f32 %v503_v31  ;;  %v1212_v31 = vld [vmem:[%s2268_s0 + $0x60] sm:$0xff] }
 0x325   :  { %1574 = vrcp.f32 %v498_v32 }
 0x32e   :  { %v1573_v33 = vpop.eup %1572 }
 0x32f   :  { %v505_v34 = vsub.f32 %v1949_v46, %v1573_v33  ;;  %v1575_v35 = vpop.eup %1574 }
 0x331   :  { %v506_v36 = vmul.f32 %v1575_v35, %v505_v34 }
 0x333   :  { %v1999_v37 = vadd.f32 %v1573_v33, %v506_v36 }
 0x335   :  { %v512_v38 = vpack.c.bf16 %v1999_v37, %v1999_v37 }
 0x337   :  { %546 = vmatmul.mubr.bf16.vlgmr.msra.gmra.mrb[12].mxu0 %v512_v38  ;;  %1399 = vmatmul.mubr.bf16.vlgmr.msra.gmra.mrb[12].mxu1 %v512_v38 }
 0x338   :  { %621 = vmatpush1.bf16.msra.mxu0 %v1698_v1  ;;  %1403 = vmatpush3.bf16.msra.mxu1 %v1737_v9 }
 0x339   :  { %622 = vmatprep.subr.bf16.mxu0 %v1706_v4  ;;  %1404 = vmatprep.subr.bf16.mxu1 %v1656_v2 }
 0x33a   :  { %652 = vmatprep.mubr.bf16.mxu0 %v1657_v3  ;;  %1418 = vmatprep.mubr.msk.bf16.mxu1 %vm1658_vm0, %v1656_v2 }
 0x33c   :  { %623 = vmatpush1.bf16.msra.mxu0 %v1714_v5  ;;  %1405 = vmatpush3.bf16.msra.mxu1 %v1756_v12 }
 0x33d   :  { %624 = vmatprep.subr.bf16.mxu0 %v1720_v6  ;;  %1406 = vmatprep.subr.bf16.mxu1 %v1656_v2 }
 0x340   :  { %625 = vmatpush1.bf16.msra.mxu0 %v1726_v7  ;;  %1407 = vmatpush3.bf16.msra.mxu1 %v1768_v14 }
 0x341   :  { %626 = vmatprep.subr.bf16.mxu0 %v1732_v8  ;;  %1408 = vmatprep.subr.bf16.mxu1 %v1656_v2 }
 0x344   :  { %627 = vmatpush1.bf16.msra.mxu0 %v1743_v10  ;;  %1409 = vmatpush3.bf16.msra.mxu1 %v1790_v18 }
 0x345   :  { %628 = vmatprep.subr.bf16.mxu0 %v1750_v11  ;;  %1410 = vmatprep.subr.bf16.mxu1 %v1656_v2 }
 0x348   :  { %629 = vmatpush1.bf16.msra.mxu0 %v1761_v13  ;;  %1411 = vmatpush3.bf16.msra.mxu1 %v1804_v20 }
 0x349   :  { %630 = vmatprep.subr.bf16.mxu0 %v1774_v15  ;;  %1412 = vmatprep.subr.bf16.mxu1 %v1656_v2 }
 0x34c   :  { %631 = vmatpush1.bf16.msra.mxu0 %v1780_v16  ;;  %1413 = vmatpush3.bf16.msra.mxu1 %v1825_v23 }
 0x34d   :  { %632 = vmatprep.subr.bf16.mxu0 %v1785_v17  ;;  %1414 = vmatprep.subr.bf16.mxu1 %v1656_v2 }
 0x350   :  { %633 = vmatpush1.bf16.msra.mxu0 %v1799_v19  ;;  %1415 = vmatpush3.bf16.msra.mxu1 %v1834_v24 }
 0x351   :  { %634 = vmatprep.subr.bf16.mxu0 %v1812_v21  ;;  %1416 = vmatprep.subr.bf16.mxu1 %v1656_v2 }
 0x354   :  { %635 = vmatpush1.bf16.msra.mxu0 %v1819_v22  ;;  %1417 = vmatpush3.bf16.msra.mxu1 %v1843_v25 }
 0x355   :  { %727 = vmatprep.subr.bf16.mxu0 %v1693_v0  ;;  %1422 = vmatprep.subr.bf16.mxu1 %v1656_v2 }
 0x40a   :  { %v547_v40 = vpop.f32.mrb[12].mxu0  ;;  %v588_v41 = vpop.f32.mrb[12].mxu1 }
 0x40b   :  { %v594_v43 = vadd.f32 %v1207_v39, %v547_v40  ;;  %v549_v44 = vpop.f32.mrb[13].mxu0  ;;  %v1400_v45 = vpop.f32.mrb[13].mxu1  ;;  %v608_v57 = vadd.f32 %v1893_v42, %v588_v41 }
 0x40c   :  { %v551_v46 = vpop.f32.mrb[14].mxu0  ;;  %v591_v47 = vpop.f32.mrb[14].mxu1  ;;  %v601_v52 = vadd.f32 %v1208_v51, %v549_v44  ;;  %v1214_v51 = vld [vmem:[%s2268_s0 + $0x70] sm:$0xff] }
 0x40d   :  { %v1210_v48 = vmul.f32 -1.442695, %v594_v43  ;;  %v552_v49 = vpop.f32.mrb[15].mxu0  ;;  %v1401_v50 = vpop.f32.mrb[15].mxu1  ;;  %v1213_v43 = vld [vmem:[%s2268_s0 + $0x68] sm:$0xff] }
 0x40e   :  { %v1211_v53 = vmul.f32 -1.442695, %v601_v52 }
 0x40f   :  { %1576 = vpow2.f32 %v1210_v48 }
 0x410   :  { %1578 = vpow2.f32 %v1211_v53 }
 0x419   :  { %v1577_v54 = vpop.eup %1576 }
 0x41a   :  { %v598_v55 = vadd.f32 1.0, %v1577_v54  ;;  %v1579_v56 = vpop.eup %1578 }
 0x41b   :  { %v605_v62 = vadd.f32 1.0, %v1579_v56 }
 0x41c   :  { %1580 = vrcp.f32 %v598_v55 }
 0x426   :  { %v1581_v58 = vpop.eup %1580 }
 0x427   :  { %v609_v60 = vmul.f32 %v1581_v58, %v608_v57 }
 0x429   :  { %v610_v61 = vadd.f32 %v1209_v59, %v609_v60 }
 0x42b   :  { %1582 = vtanh.f32 %v610_v61 }
 0x42c   :  { %1584 = vrcp.f32 %v605_v62 }
 0x435   :  { %v1583_v63 = vpop.eup %1582 }
 0x436   :  { %v612_v26 = vsub.f32 %v1999_v37, %v1583_v63  ;;  %v1585_v27 = vpop.eup %1584 }
 0x438   :  { %v613_v28 = vmul.f32 %v1585_v27, %v612_v26 }
 0x43a   :  { %v2049_v29 = vadd.f32 %v1583_v63, %v613_v28 }
 0x43c   :  { %v619_v30 = vpack.c.bf16 %v2049_v29, %v2049_v29 }
 0x43e   :  { %653 = vmatmul.mubr.bf16.vlgmr.msra.gmra.mrb[16].mxu0 %v619_v30  ;;  %1419 = vmatmul.mubr.bf16.vlgmr.msra.gmra.mrb[16].mxu1 %v619_v30 }
 0x43f   :  { %728 = vmatpush1.bf16.msra.mxu0 %v1698_v1  ;;  %1423 = vmatpush3.bf16.msra.mxu1 %v1737_v9 }
 0x440   :  { %729 = vmatprep.subr.bf16.mxu0 %v1706_v4  ;;  %1424 = vmatprep.subr.bf16.mxu1 %v1656_v2 }
 0x441   :  { %759 = vmatprep.mubr.bf16.mxu0 %v1657_v3  ;;  %1438 = vmatprep.mubr.msk.bf16.mxu1 %vm1658_vm0, %v1656_v2 }
 0x443   :  { %730 = vmatpush1.bf16.msra.mxu0 %v1714_v5  ;;  %1425 = vmatpush3.bf16.msra.mxu1 %v1756_v12 }
 0x444   :  { %731 = vmatprep.subr.bf16.mxu0 %v1720_v6  ;;  %1426 = vmatprep.subr.bf16.mxu1 %v1656_v2 }
 0x447   :  { %732 = vmatpush1.bf16.msra.mxu0 %v1726_v7  ;;  %1427 = vmatpush3.bf16.msra.mxu1 %v1768_v14 }
 0x448   :  { %733 = vmatprep.subr.bf16.mxu0 %v1732_v8  ;;  %1428 = vmatprep.subr.bf16.mxu1 %v1656_v2 }
 0x44b   :  { %734 = vmatpush1.bf16.msra.mxu0 %v1743_v10  ;;  %1429 = vmatpush3.bf16.msra.mxu1 %v1790_v18 }
 0x44c   :  { %735 = vmatprep.subr.bf16.mxu0 %v1750_v11  ;;  %1430 = vmatprep.subr.bf16.mxu1 %v1656_v2 }
 0x44f   :  { %736 = vmatpush1.bf16.msra.mxu0 %v1761_v13  ;;  %1431 = vmatpush3.bf16.msra.mxu1 %v1804_v20 }
 0x450   :  { %737 = vmatprep.subr.bf16.mxu0 %v1774_v15  ;;  %1432 = vmatprep.subr.bf16.mxu1 %v1656_v2 }
 0x453   :  { %738 = vmatpush1.bf16.msra.mxu0 %v1780_v16  ;;  %1433 = vmatpush3.bf16.msra.mxu1 %v1825_v23 }
 0x454   :  { %739 = vmatprep.subr.bf16.mxu0 %v1785_v17  ;;  %1434 = vmatprep.subr.bf16.mxu1 %v1656_v2 }
 0x457   :  { %740 = vmatpush1.bf16.msra.mxu0 %v1799_v19  ;;  %1435 = vmatpush3.bf16.msra.mxu1 %v1834_v24 }
 0x458   :  { %741 = vmatprep.subr.bf16.mxu0 %v1812_v21  ;;  %1436 = vmatprep.subr.bf16.mxu1 %v1656_v2 }
 0x45b   :  { %742 = vmatpush1.bf16.msra.mxu0 %v1819_v22  ;;  %1437 = vmatpush3.bf16.msra.mxu1 %v1843_v25 }
 0x45c   :  { %834 = vmatprep.subr.bf16.mxu0 %v1693_v0  ;;  %1442 = vmatprep.subr.bf16.mxu1 %v1656_v2 }
 0x511   :  { %v654_v32 = vpop.f32.mrb[16].mxu0  ;;  %v695_v33 = vpop.f32.mrb[16].mxu1 }
 0x512   :  { %v701_v34 = vadd.f32 %v1212_v31, %v654_v32  ;;  %v656_v35 = vpop.f32.mrb[17].mxu0  ;;  %v1420_v36 = vpop.f32.mrb[17].mxu1  ;;  %v715_v49 = vadd.f32 %v1893_v42, %v695_v33 }
 0x513   :  { %v658_v37 = vpop.f32.mrb[18].mxu0  ;;  %v698_v38 = vpop.f32.mrb[18].mxu1  ;;  %v708_v44 = vadd.f32 %v1213_v43, %v656_v35  ;;  %v1219_v35 = vld [vmem:[%s2268_s0 + $0x88] sm:$0xff] }
 0x514   :  { %v1215_v39 = vmul.f32 -1.442695, %v701_v34  ;;  %v659_v40 = vpop.f32.mrb[19].mxu0  ;;  %v1421_v41 = vpop.f32.mrb[19].mxu1 }
 0x515   :  { %v1216_v45 = vmul.f32 -1.442695, %v708_v44 }
 0x516   :  { %1586 = vpow2.f32 %v1215_v39 }
 0x517   :  { %1588 = vpow2.f32 %v1216_v45 }
 0x520   :  { %v1587_v46 = vpop.eup %1586 }
 0x521   :  { %v705_v47 = vadd.f32 1.0, %v1587_v46  ;;  %v1589_v48 = vpop.eup %1588  ;;  %v1626_v46 = vld [vmem:[%s2269_s1] ss:$12 sps:$4 sm:$0xff]  }
 0x522   :  { %v712_v54 = vadd.f32 1.0, %v1589_v48  ;;  %v1628_v48 = vld [vmem:[%s2269_s1 + $0x18] ss:$12 sps:$4 sm:$0xff]  }
 0x523   :  { %1590 = vrcp.f32 %v705_v47  ;;  %v1627_v47 = vld [vmem:[%s2269_s1 + $0x1c] ss:$12 sps:$4 sm:$0xff]  }
 0x52d   :  { %v1591_v50 = vpop.eup %1590 }
 0x52e   :  { %v716_v52 = vmul.f32 %v1591_v50, %v715_v49  ;;  %v1631_v49 = vld [vmem:[%s2269_s1 + $0x4c] ss:$12 sps:$4 sm:$0xff]  }
 0x530   :  { %v717_v53 = vadd.f32 %v1214_v51, %v716_v52 }
 0x532   :  { %1592 = vtanh.f32 %v717_v53  ;;  %v1224_v53 = vld [vmem:[%s2268_s0 + $0xa0] sm:$0xff] }
 0x533   :  { %1594 = vrcp.f32 %v712_v54 }
 0x53c   :  { %v1593_v55 = vpop.eup %1592 }
 0x53d   :  { %v719_v56 = vsub.f32 %v2049_v29, %v1593_v55  ;;  %v1595_v57 = vpop.eup %1594 }
 0x53f   :  { %v720_v58 = vmul.f32 %v1595_v57, %v719_v56 }
 0x541   :  { %v2099_v59 = vadd.f32 %v1593_v55, %v720_v58 }
 0x543   :  { %v726_v60 = vpack.c.bf16 %v2099_v59, %v2099_v59 }
 0x545   :  { %760 = vmatmul.mubr.bf16.vlgmr.msra.gmra.mrb[20].mxu0 %v726_v60  ;;  %1439 = vmatmul.mubr.bf16.vlgmr.msra.gmra.mrb[20].mxu1 %v726_v60 }
 0x546   :  { %835 = vmatpush1.bf16.msra.mxu0 %v1698_v1  ;;  %1443 = vmatpush3.bf16.msra.mxu1 %v1737_v9  ;;  %v1217_v1 = vld [vmem:[%s2268_s0 + $0x78] sm:$0xff] }
 0x547   :  { %836 = vmatprep.subr.bf16.mxu0 %v1706_v4  ;;  %1444 = vmatprep.subr.bf16.mxu1 %v1656_v2 }
 0x548   :  { %866 = vmatprep.mubr.bf16.mxu0 %v1657_v3  ;;  %1458 = vmatprep.mubr.msk.bf16.mxu1 %vm1658_vm0, %v1656_v2 }
 0x54a   :  { %837 = vmatpush1.bf16.msra.mxu0 %v1714_v5  ;;  %1445 = vmatpush3.bf16.msra.mxu1 %v1756_v12 }
 0x54b   :  { %838 = vmatprep.subr.bf16.mxu0 %v1720_v6  ;;  %1446 = vmatprep.subr.bf16.mxu1 %v1656_v2 }
 0x54e   :  { %839 = vmatpush1.bf16.msra.mxu0 %v1726_v7  ;;  %1447 = vmatpush3.bf16.msra.mxu1 %v1768_v14 }
 0x54f   :  { %840 = vmatprep.subr.bf16.mxu0 %v1732_v8  ;;  %1448 = vmatprep.subr.bf16.mxu1 %v1656_v2 }
 0x552   :  { %841 = vmatpush1.bf16.msra.mxu0 %v1743_v10  ;;  %1449 = vmatpush3.bf16.msra.mxu1 %v1790_v18 }
 0x553   :  { %842 = vmatprep.subr.bf16.mxu0 %v1750_v11  ;;  %1450 = vmatprep.subr.bf16.mxu1 %v1656_v2 }
 0x556   :  { %843 = vmatpush1.bf16.msra.mxu0 %v1761_v13  ;;  %1451 = vmatpush3.bf16.msra.mxu1 %v1804_v20 }
 0x557   :  { %844 = vmatprep.subr.bf16.mxu0 %v1774_v15  ;;  %1452 = vmatprep.subr.bf16.mxu1 %v1656_v2 }
 0x55a   :  { %845 = vmatpush1.bf16.msra.mxu0 %v1780_v16  ;;  %1453 = vmatpush3.bf16.msra.mxu1 %v1825_v23 }
 0x55b   :  { %846 = vmatprep.subr.bf16.mxu0 %v1785_v17  ;;  %1454 = vmatprep.subr.bf16.mxu1 %v1656_v2 }
 0x55e   :  { %847 = vmatpush1.bf16.msra.mxu0 %v1799_v19  ;;  %1455 = vmatpush3.bf16.msra.mxu1 %v1834_v24 }
 0x55f   :  { %848 = vmatprep.subr.bf16.mxu0 %v1812_v21  ;;  %1456 = vmatprep.subr.bf16.mxu1 %v1656_v2 }
 0x562   :  { %849 = vmatpush1.bf16.msra.mxu0 %v1819_v22  ;;  %1457 = vmatpush3.bf16.msra.mxu1 %v1843_v25 }
 0x563   :  { %941 = vmatprep.subr.bf16.mxu0 %v1693_v0  ;;  %1462 = vmatprep.subr.bf16.mxu1 %v1656_v2  ;;  %v1218_v0 = vld [vmem:[%s2268_s0 + $0x80] sm:$0xff] }
 0x618   :  { %v761_v4 = vpop.f32.mrb[20].mxu0  ;;  %v802_v5 = vpop.f32.mrb[20].mxu1 }
 0x619   :  { %v808_v6 = vadd.f32 %v1217_v1, %v761_v4  ;;  %v763_v7 = vpop.f32.mrb[21].mxu0  ;;  %v1440_v8 = vpop.f32.mrb[21].mxu1  ;;  %v822_v33 = vadd.f32 %v1893_v42, %v802_v5  ;;  %v1538_v5 = vld [vmem:[%s2271_s3] sm:$0xff]  }
 0x61a   :  { %v765_v61 = vpop.f32.mrb[22].mxu0  ;;  %v805_v62 = vpop.f32.mrb[22].mxu1  ;;  %v815_v28 = vadd.f32 %v1218_v0, %v763_v7  ;;  %v1540_v7 = vld [vmem:[%s2271_s3 + $0x10] sm:$0xff]   ;;  %v1541_v8 = vld [vmem:[%s2271_s3 + $0x18] sm:$0xff]  }
 0x61b   :  { %v1220_v63 = vmul.f32 -1.442695, %v808_v6  ;;  %v766_v26 = vpop.f32.mrb[23].mxu0  ;;  %v1441_v27 = vpop.f32.mrb[23].mxu1  ;;  %v1539_v6 = vld [vmem:[%s2271_s3 + $0x8] sm:$0xff]   ;;  %v1542_v61 = vld [vmem:[%s2271_s3 + $0x20] sm:$0xff]  }
 0x61c   :  { %v1221_v29 = vmul.f32 -1.442695, %v815_v28  ;;  %v1543_v62 = vld [vmem:[%s2271_s3 + $0x28] sm:$0xff]   ;;  %v1545_v26 = vld [vmem:[%s2271_s3 + $0x38] sm:$0xff]  }
 0x61d   :  { %1596 = vpow2.f32 %v1220_v63  ;;  %v1544_v63 = vld [vmem:[%s2271_s3 + $0x30] sm:$0xff]   ;;  %v1227_v27 = vld [vmem:[%s2268_s0 + $0xa8] sm:$0xff] }
 0x61e   :  { %1598 = vpow2.f32 %v1221_v29 }
 0x627   :  { %v1597_v30 = vpop.eup %1596 }
 0x628   :  { %v812_v31 = vadd.f32 1.0, %v1597_v30  ;;  %v1599_v32 = vpop.eup %1598 }
 0x629   :  { %v819_v38 = vadd.f32 1.0, %v1599_v32 }
 0x62a   :  { %1600 = vrcp.f32 %v812_v31 }
 0x634   :  { %v1601_v34 = vpop.eup %1600 }
 0x635   :  { %v823_v36 = vmul.f32 %v1601_v34, %v822_v33 }
 0x637   :  { %v824_v37 = vadd.f32 %v1219_v35, %v823_v36 }
 0x639   :  { %1602 = vtanh.f32 %v824_v37 }
 0x63a   :  { %1604 = vrcp.f32 %v819_v38 }
 0x643   :  { %v1603_v39 = vpop.eup %1602 }
 0x644   :  { %v826_v40 = vsub.f32 %v2099_v59, %v1603_v39  ;;  %v1605_v41 = vpop.eup %1604 }
 0x646   :  { %v827_v43 = vmul.f32 %v1605_v41, %v826_v40 }
 0x648   :  { %v2149_v44 = vadd.f32 %v1603_v39, %v827_v43 }
 0x64a   :  { %v833_v45 = vpack.c.bf16 %v2149_v44, %v2149_v44 }
 0x64c   :  { %867 = vmatmul.mubr.bf16.vlgmr.msra.gmra.mrb[24].mxu0 %v833_v45  ;;  %1459 = vmatmul.mubr.bf16.vlgmr.msra.gmra.mrb[24].mxu1 %v833_v45  ;;  %v1229_v45 = vld [vmem:[%s2268_s0 + $0xb8] sm:$0xff] }
 0x64d   :  { %942 = vmatpush1.bf16.msra.mxu0 %v1626_v46  ;;  %1463 = vmatpush3.bf16.msra.mxu1 %v1737_v9  ;;  %v1629_v9 = vld [vmem:[%s2269_s1 + $0x34] ss:$12 sps:$4 sm:$0xff]  }
 0x64e   :  { %943 = vmatprep.subr.bf16.mxu0 %v1627_v47  ;;  %1464 = vmatprep.subr.bf16.mxu1 %v1656_v2 }
 0x64f   :  { %973 = vmatprep.mubr.bf16.mxu0 %v1657_v3  ;;  %1478 = vmatprep.mubr.msk.bf16.mxu1 %vm1658_vm0, %v1656_v2  ;;  %v1630_v3 = vld [vmem:[%s2269_s1 + $0x30] ss:$12 sps:$4 sm:$0xff]  }
 0x651   :  { %944 = vmatpush1.bf16.msra.mxu0 %v1628_v48  ;;  %1465 = vmatpush3.bf16.msra.mxu1 %v1756_v12 }
 0x652   :  { %945 = vmatprep.subr.bf16.mxu0 %v1629_v9  ;;  %1466 = vmatprep.subr.bf16.mxu1 %v1656_v2 }
 0x655   :  { %946 = vmatpush1.bf16.msra.mxu0 %v1630_v3  ;;  %1467 = vmatpush3.bf16.msra.mxu1 %v1768_v14 }
 0x656   :  { %947 = vmatprep.subr.bf16.mxu0 %v1631_v49  ;;  %1468 = vmatprep.subr.bf16.mxu1 %v1656_v2 }
 0x659   :  { %948 = vmatpush1.bf16.msra.mxu0 %v1743_v10  ;;  %1469 = vmatpush3.bf16.msra.mxu1 %v1790_v18  ;;  %v1222_v10 = vld [vmem:[%s2268_s0 + $0x90] sm:$0xff] }
 0x65a   :  { %949 = vmatprep.subr.bf16.mxu0 %v1750_v11  ;;  %1470 = vmatprep.subr.bf16.mxu1 %v1656_v2 }
 0x65d   :  { %950 = vmatpush1.bf16.msra.mxu0 %v1761_v13  ;;  %1471 = vmatpush3.bf16.msra.mxu1 %v1804_v20 }
 0x65e   :  { %951 = vmatprep.subr.bf16.mxu0 %v1774_v15  ;;  %1472 = vmatprep.subr.bf16.mxu1 %v1656_v2 }
 0x661   :  { %952 = vmatpush1.bf16.msra.mxu0 %v1780_v16  ;;  %1473 = vmatpush3.bf16.msra.mxu1 %v1825_v23 }
 0x662   :  { %953 = vmatprep.subr.bf16.mxu0 %v1785_v17  ;;  %1474 = vmatprep.subr.bf16.mxu1 %v1656_v2 }
 0x665   :  { %954 = vmatpush1.bf16.msra.mxu0 %v1799_v19  ;;  %1475 = vmatpush3.bf16.msra.mxu1 %v1834_v24 }
 0x666   :  { %955 = vmatprep.subr.bf16.mxu0 %v1812_v21  ;;  %1476 = vmatprep.subr.bf16.mxu1 %v1656_v2  ;;  %v1223_v21 = vld [vmem:[%s2268_s0 + $0x98] sm:$0xff] }
 0x669   :  { %956 = vmatpush1.bf16.msra.mxu0 %v1819_v22  ;;  %1477 = vmatpush3.bf16.msra.mxu1 %v1843_v25 }
 0x66a   :  { %1482 = vmatprep.subr.bf16.mxu0 %v1656_v2 }
 0x71f   :  { %v868_v11 = vpop.f32.mrb[24].mxu0  ;;  %v909_v12 = vpop.f32.mrb[24].mxu1 }
 0x720   :  { %v915_v13 = vadd.f32 %v1222_v10, %v868_v11  ;;  %v870_v14 = vpop.f32.mrb[25].mxu0  ;;  %v1460_v15 = vpop.f32.mrb[25].mxu1  ;;  %v929_v51 = vadd.f32 %v1893_v42, %v909_v12 }
 0x721   :  { %v872_v16 = vpop.f32.mrb[26].mxu0  ;;  %v912_v17 = vpop.f32.mrb[26].mxu1  ;;  %v922_v22 = vadd.f32 %v1223_v21, %v870_v14 }
 0x722   :  { %v1225_v18 = vmul.f32 -1.442695, %v915_v13  ;;  %v873_v19 = vpop.f32.mrb[27].mxu0  ;;  %v1461_v20 = vpop.f32.mrb[27].mxu1 }
 0x723   :  { %v1226_v23 = vmul.f32 -1.442695, %v922_v22 }
 0x724   :  { %1606 = vpow2.f32 %v1225_v18 }
 0x725   :  { %1608 = vpow2.f32 %v1226_v23 }
 0x72e   :  { %v1607_v24 = vpop.eup %1606 }
 0x72f   :  { %v919_v25 = vadd.f32 1.0, %v1607_v24  ;;  %v1609_v50 = vpop.eup %1608 }
 0x730   :  { %v926_v56 = vadd.f32 1.0, %v1609_v50 }
 0x731   :  { %1610 = vrcp.f32 %v919_v25 }
 0x73b   :  { %v1611_v52 = vpop.eup %1610 }
 0x73c   :  { %v930_v54 = vmul.f32 %v1611_v52, %v929_v51 }
 0x73e   :  { %v931_v55 = vadd.f32 %v1224_v53, %v930_v54 }
 0x740   :  { %1612 = vtanh.f32 %v931_v55 }
 0x741   :  { %1614 = vrcp.f32 %v926_v56 }
 0x74a   :  { %v1613_v57 = vpop.eup %1612 }
 0x74b   :  { %v933_v58 = vsub.f32 %v2149_v44, %v1613_v57  ;;  %v1615_v59 = vpop.eup %1614 }
 0x74d   :  { %v934_v60 = vmul.f32 %v1615_v59, %v933_v58 }
 0x74f   :  { %v935_v1 = vadd.f32 %v1613_v57, %v934_v60 }
 0x751   :  { %v940_v4 = vpack.c.bf16 %v935_v1, %v935_v1 }
 0x753   :  { %974 = vmatmul.mubr.bf16.vlgmr.msra.gmra.mrb[28].mxu0 %v940_v4  ;;  %1479 = vmatmul.mubr.bf16.vlgmr.msra.gmra.mrb[28].mxu1 %v940_v4 }
 0x754   :  { %1498 = vmatprep.mubr.msk.bf16.mxu0 %vm1658_vm0, %v1656_v2  ;;  %1483 = vmatpush3.bf16.msra.mxu0 %v1538_v5 }
 0x755   :  { %1484 = vmatprep.subr.bf16.mxu0 %v1656_v2 }
 0x758   :  { %1485 = vmatpush3.bf16.msra.mxu0 %v1539_v6 }
 0x759   :  { %1486 = vmatprep.subr.bf16.mxu0 %v1656_v2 }
 0x75c   :  { %1487 = vmatpush3.bf16.msra.mxu0 %v1540_v7 }
 0x75d   :  { %1488 = vmatprep.subr.bf16.mxu0 %v1656_v2 }
 0x760   :  { %1489 = vmatpush3.bf16.msra.mxu0 %v1541_v8 }
 0x761   :  { %1490 = vmatprep.subr.bf16.mxu0 %v1656_v2 }
 0x764   :  { %1491 = vmatpush3.bf16.msra.mxu0 %v1542_v61 }
 0x765   :  { %1492 = vmatprep.subr.bf16.mxu0 %v1656_v2 }
 0x768   :  { %1493 = vmatpush3.bf16.msra.mxu0 %v1543_v62 }
 0x769   :  { %1494 = vmatprep.subr.bf16.mxu0 %v1656_v2 }
 0x76c   :  { %1495 = vmatpush3.bf16.msra.mxu0 %v1544_v63 }
 0x76d   :  { %1496 = vmatprep.subr.bf16.mxu0 %v1656_v2  ;;  %v1228_v2 = vld [vmem:[%s2268_s0 + $0xb0] sm:$0xff]  ;;  %s1632_s0 = scalar_lea.vmem %s1163_s16, 128 }
 0x76e   :  { %p1633_p0 = scmp.ne.s32.totalorder %s1163_s16, %s1632_s0  ;;  %p1638_p2 = scmp.lt.s32.totalorder %s1632_s0, %s1632_s0 }
 0x770   :  { %1497 = vmatpush3.bf16.msra.mxu0 %v1545_v26  ;;  %p1639_p3 = por %p1638_p2, %p1637_p1 }
 0x772   :  { %p1640_p4 = pnand %p1639_p3, %p1633_p0 }
 0x826   :  { %v975_v0 = vpop.f32.mrb[28].mxu0  ;;  %v1016_v28 = vpop.f32.mrb[28].mxu1 }
 0x827   :  { %v1022_v29 = vadd.f32 %v1227_v27, %v975_v0  ;;  %v977_v30 = vpop.f32.mrb[29].mxu0  ;;  %v1480_v31 = vpop.f32.mrb[29].mxu1  ;;  %v1036_v43 = vadd.f32 %v1893_v42, %v1016_v28  ;;  %v1232_v42 = vld [vmem:[%s2272_s4] ss:$0 sm:$0xff] }
 0x828   :  { %v979_v32 = vpop.f32.mrb[30].mxu0  ;;  %v1019_v33 = vpop.f32.mrb[30].mxu1  ;;  %v1029_v37 = vadd.f32 %v1228_v2, %v977_v30 }
 0x829   :  { %v1230_v34 = vmul.f32 -1.442695, %v1022_v29  ;;  %v980_v35 = vpop.f32.mrb[31].mxu0  ;;  %v1481_v36 = vpop.f32.mrb[31].mxu1 }
 0x82a   :  { %v1231_v38 = vmul.f32 -1.442695, %v1029_v37 }
 0x82b   :  { %1616 = vpow2.f32 %v1230_v34 }
 0x82c   :  { %1618 = vpow2.f32 %v1231_v38 }
 0x835   :  { %v1617_v39 = vpop.eup %1616 }
 0x836   :  { %v1026_v40 = vadd.f32 1.0, %v1617_v39  ;;  %v1619_v41 = vpop.eup %1618 }
 0x837   :  { %v1033_v48 = vadd.f32 1.0, %v1619_v41 }
 0x838   :  { %1620 = vrcp.f32 %v1026_v40 }
 0x842   :  { %v1621_v44 = vpop.eup %1620 }
 0x843   :  { %v1037_v46 = vmul.f32 %v1621_v44, %v1036_v43 }
 0x845   :  { %v1038_v47 = vadd.f32 %v1229_v45, %v1037_v46 }
 0x847   :  { %1622 = vtanh.f32 %v1038_v47 }
 0x848   :  { %1624 = vrcp.f32 %v1033_v48 }
 0x851   :  { %v1623_v9 = vpop.eup %1622 }
 0x852   :  { %v1040_v3 = vsub.f32 %v935_v1, %v1623_v9  ;;  %v1625_v49 = vpop.eup %1624 }
 0x854   :  { %v1041_v10 = vmul.f32 %v1625_v49, %v1040_v3 }
 0x856   :  { %v1042_v11 = vadd.f32 %v1623_v9, %v1041_v10 }
 0x858   :  { %v1043_v12 = vpack.c.bf16 %v1042_v11, %v1042_v11 }
 0x85a   :  { %1499 = vmatmul.mubr.bf16.vlgmr.msra.gmra.mrb[32].mxu0 %v1043_v12 }
 0x92d   :  { %v1149_v13 = vpop.f32.mrb[32].mxu0 }
 0x92e   :  { %v1150_v14 = vadd.f32 %v1232_v42, %v1149_v13  ;;  %v1500_v15 = vpop.f32.mrb[33].mxu0 }
 0x92f   :  { %v1152_v16 = vpop.f32.mrb[34].mxu0 }
 0x930   :  { %1155 = vst [vmem:[#allocation2] sm:$0xff] %v1150_v14  ;;  %v1501_v17 = vpop.f32.mrb[35].mxu0 }
 0x931   :  { %1643 = shalt.err (!%p1640_p4)
}
 0x932   :  { %s1644_s4 = scalar_lea.hbm %s2273_s5, 128 }
 0x933   :  { %p1645_p5 = scmp.ne.s32.totalorder %s2273_s5, %s1644_s4  ;;  %p1648_p6 = scmp.lt.u32.totalorder %s1644_s4, %s2273_s5 }
 0x935   :  { %p1650_p7 = pnand %p1648_p6, %p1645_p5 }
 0x937   :  { %1653 = shalt.err (!%p1650_p7)
}
 0x938   :  { %1165 = dma.vmem_to_hbm [thread:$0]  %s1163_s16, 128, %s2273_s5, [#allocation3]  }
 0x939   :  { %1654 = dma.done.wait [#allocation3], 128  }
 0x93a   :  { %1655 = vsyncadd [#allocation3], 4294967168 }
 0x93b   :  { %1169 = vsyncpa [#allocation3], 1 }

</bundles_post_ra>
